<compile_context>
chip_gen: v6e
topology: v6e:2x2x1
jax: 0.10.0
libtpu: 0.0.40
codegen_flags: <defaults>
</compile_context>

<pallas_src>
import math

import jax
import jax.numpy as jnp
from jax.experimental import pallas as pl
from jax.experimental.pallas import tpu as pltpu

SCALE = math.sqrt(0.5)

# ----------------------------- model hyper-params ---------------------------
INPUT_DIM = 50       # src vocab
OUTPUT_DIM = 50      # trg vocab
EMB_DIM = 32
HID_DIM = 32
ENC_LAYERS = 2
DEC_LAYERS = 2
KERNEL_SIZE = 3
MAX_LEN = 16
TRG_PAD_IDX = 1      # decoder causal padding filled with pad index (tutorial semantics)

BATCH = 2
SRC_LEN = 8
TRG_LEN = 8

# lane-dense padding widths
SLAB_LANES = 128     # lane width of the packed parameter slab
VPAD = 128           # vocab rows padded so the one-hot matmul uses full 128 lanes
CONV_PAD = 128       # im2col contraction padded from K*H=96 to 128
FC_PAD = 128         # fc_out output lanes
ATTN_PAD = 128       # attention output lanes (sliced back to SRC_LEN on host)


# -------------------------- packed-parameter slab layout ---------------------
def _build_layout():
    entries = [
        ("enc_tok_emb", VPAD, EMB_DIM),
        ("enc_pos_emb", MAX_LEN, EMB_DIM),
        ("enc_emb2hid_w", EMB_DIM, HID_DIM),
        ("enc_emb2hid_b", 1, HID_DIM),
        ("enc_hid2emb_w", HID_DIM, EMB_DIM),
        ("enc_hid2emb_b", 1, EMB_DIM),
    ]
    for l in range(ENC_LAYERS):
        entries += [(f"enc_conv_w_{l}", CONV_PAD, 2 * HID_DIM),
                    (f"enc_conv_b_{l}", 1, 2 * HID_DIM)]
    entries += [
        ("dec_tok_emb", VPAD, EMB_DIM),
        ("dec_pos_emb", MAX_LEN, EMB_DIM),
        ("dec_emb2hid_w", EMB_DIM, HID_DIM),
        ("dec_emb2hid_b", 1, HID_DIM),
        ("dec_hid2emb_w", HID_DIM, EMB_DIM),
        ("dec_hid2emb_b", 1, EMB_DIM),
        ("attn_hid2emb_w", HID_DIM, EMB_DIM),
        ("attn_hid2emb_b", 1, EMB_DIM),
        ("attn_emb2hid_w", EMB_DIM, HID_DIM),
        ("attn_emb2hid_b", 1, HID_DIM),
    ]
    for l in range(DEC_LAYERS):
        entries += [(f"dec_conv_w_{l}", CONV_PAD, 2 * HID_DIM),
                    (f"dec_conv_b_{l}", 1, 2 * HID_DIM)]
    entries += [("fc_out_w", EMB_DIM, FC_PAD), ("fc_out_b", 1, FC_PAD)]

    layout, off = {}, 0
    for name, rows, cols in entries:
        layout[name] = (off, rows, cols)
        off += ((rows + 7) // 8) * 8        # sublane-aligned row offsets
    return layout, off


SLAB_LAYOUT, SLAB_ROWS = _build_layout()


# ------------------------------ in-kernel helpers ----------------------------
def _dot(x, w):
    """[B, L, Cin] @ [Cin, Cout] -> [B, L, Cout]; bf16 MXU inputs, f32 accumulation."""
    B, L, Cin = x.shape
    y = jax.lax.dot_general(
        x.reshape(B * L, Cin).astype(jnp.bfloat16),
        w.astype(jnp.bfloat16),
        dimension_numbers=(((1,), (0,)), ((), ())),
        preferred_element_type=jnp.float32)
    return y.reshape(B, L, w.shape[-1])


def _embed(ids, tok_tbl, pos_tbl):
    """ids: [B, L, 1] int32 -> [B, L, E] via one-hot MXU matmul + positional rows."""
    B, L, _ = ids.shape
    V = tok_tbl.shape[0]                       # padded vocab rows (128)
    iota = jax.lax.broadcasted_iota(jnp.int32, (B, L, V), 2)
    one_hot = (iota == ids).astype(jnp.bfloat16)
    return _dot(one_hot, tok_tbl) + pos_tbl[0:L, :]


def _conv_glu(conv_input, cw, cb, *, causal, pad_val):
    """Conv1d(K taps) as a single im2col matmul + GLU; padding kept as values (vregs)."""
    B, L, H = conv_input.shape
    K = KERNEL_SIZE
    if causal:
        parts = [jnp.full((B, K - 1, H), pad_val, jnp.float32), conv_input]
    else:
        p = (K - 1) // 2
        z = jnp.zeros((B, p, H), jnp.float32)
        parts = [z, conv_input, z]
    xp = jnp.concatenate(parts, axis=1)                                  # [B, L+K-1, H]
    cols = [jax.lax.slice_in_dim(xp, k, k + L, axis=1) for k in range(K)]
    if CONV_PAD > K * H:                                                 # pad contraction 96->128
        cols.append(jnp.zeros((B, L, CONV_PAD - K * H), jnp.float32))
    cols = jnp.concatenate(cols, axis=-1)                                # [B, L, CONV_PAD]
    acc = _dot(cols, cw) + cb                                            # [B, L, 2H], f32
    return acc[..., :H] * jax.nn.sigmoid(acc[..., H:])                   # GLU, f32 elementwise


# ------------------------------- fused kernel --------------------------------
def _seq2seq_kernel(src_ref, trg_ref, slab_ref, logits_ref, attn_ref):
    def view(name):
        off, rows, cols = SLAB_LAYOUT[name]
        return slab_ref[off:off + rows, :cols]          # static carve, zero-cost

    B, S, _ = src_ref.shape
    T = trg_ref.shape[1]

    # ------------------------------- encoder --------------------------------
    emb_e = _embed(src_ref[...], view("enc_tok_emb"), view("enc_pos_emb"))      # [B,S,E]
    x = _dot(emb_e, view("enc_emb2hid_w")) + view("enc_emb2hid_b")              # [B,S,H]
    for l in range(ENC_LAYERS):
        glu = _conv_glu(x, view(f"enc_conv_w_{l}"), view(f"enc_conv_b_{l}"),
                        causal=False, pad_val=0.0)
        x = (glu + x) * SCALE                                                   # fused residual
    enc_conved = _dot(x, view("enc_hid2emb_w")) + view("enc_hid2emb_b")         # [B,S,E]
    enc_combined = (enc_conved + emb_e) * SCALE                                 # [B,S,E]

    # ------------------------------- decoder --------------------------------
    emb_d = _embed(trg_ref[...], view("dec_tok_emb"), view("dec_pos_emb"))      # [B,T,E]
    x = _dot(emb_d, view("dec_emb2hid_w")) + view("dec_emb2hid_b")              # [B,T,H]
    ek = enc_conved.astype(jnp.bfloat16)
    ev = enc_combined.astype(jnp.bfloat16)

    attn = None
    for l in range(DEC_LAYERS):
        # causal left pad filled with the literal trg_pad_idx value in *hidden* space
        # (faithful to the tutorial reference quirk; do not "fix" to embedding-space pad).
        conved = _conv_glu(x, view(f"dec_conv_w_{l}"), view(f"dec_conv_b_{l}"),
                           causal=True, pad_val=float(TRG_PAD_IDX))
        # --- attention ---
        conved_emb = _dot(conved, view("attn_hid2emb_w")) + view("attn_hid2emb_b")
        q = (conved_emb + emb_d) * SCALE                                        # [B,T,E]
        energy = jnp.einsum("bte,bse->bts", q.astype(jnp.bfloat16), ek,
                            preferred_element_type=jnp.float32)                 # [B,T,S]
        m = jnp.max(energy, axis=-1, keepdims=True)
        p = jnp.exp(energy - m)
        attn = p * pl.reciprocal(jnp.sum(p, axis=-1, keepdims=True), approx=True)
        attended = jnp.einsum("bts,bse->bte", attn.astype(jnp.bfloat16), ev,
                              preferred_element_type=jnp.float32)               # [B,T,E]
        attended_hid = _dot(attended, view("attn_emb2hid_w")) + view("attn_emb2hid_b")
        conved = (conved + attended_hid) * SCALE                                # attended_combined
        x = (conved + x) * SCALE                                                # layer residual

    dec_emb = _dot(x, view("dec_hid2emb_w")) + view("dec_hid2emb_b")            # [B,T,E]
    logits_ref[...] = _dot(dec_emb, view("fc_out_w")) + view("fc_out_b")        # [B,T,128] lane-dense
    attn_ref[...] = jnp.concatenate(
        [attn, jnp.zeros((B, T, ATTN_PAD - S), jnp.float32)], axis=-1)          # lane-dense store


# ------------------------------- host wrapper --------------------------------
def seq2seq_cnn_forward(src, trg, slab):
    B, S = src.shape
    T = trg.shape[1]
    logits_pad, attn_pad = pl.pallas_call(
        _seq2seq_kernel,
        out_shape=(jax.ShapeDtypeStruct((B, T, FC_PAD), jnp.float32),
                   jax.ShapeDtypeStruct((B, T, ATTN_PAD), jnp.float32)),
        grid=(B,),
        in_specs=[
            pl.BlockSpec((1, S, 1), lambda b: (b, 0, 0)),
            pl.BlockSpec((1, T, 1), lambda b: (b, 0, 0)),
            pl.BlockSpec((SLAB_ROWS, SLAB_LANES), lambda b: (0, 0)),
        ],
        out_specs=(pl.BlockSpec((1, T, FC_PAD), lambda b: (b, 0, 0)),
                   pl.BlockSpec((1, T, ATTN_PAD), lambda b: (b, 0, 0))),
        compiler_params=pltpu.CompilerParams(dimension_semantics=("parallel",)),
    )(src.reshape(B, S, 1).astype(jnp.int32),
      trg.reshape(B, T, 1).astype(jnp.int32),
      slab)
    # slice lane-padded outputs back to the module's true widths (fused inside jit)
    return logits_pad[..., :OUTPUT_DIM], attn_pad[..., :S]


# ----------------------------- parameter creation -----------------------------
def init_raw_params(key):
    def nrm(k, shape, s=0.05):
        return jax.random.normal(k, shape, jnp.float32) * s

    keys = jax.random.split(key, 40)
    ki = iter(keys)
    p = {}
    # encoder
    p["enc_tok_emb"] = nrm(next(ki), (INPUT_DIM, EMB_DIM), 0.1)
    p["enc_pos_emb"] = nrm(next(ki), (MAX_LEN, EMB_DIM), 0.1)
    p["enc_emb2hid_w"] = nrm(next(ki), (EMB_DIM, HID_DIM))
    p["enc_emb2hid_b"] = nrm(next(ki), (1, HID_DIM), 0.01)
    p["enc_hid2emb_w"] = nrm(next(ki), (HID_DIM, EMB_DIM))
    p["enc_hid2emb_b"] = nrm(next(ki), (1, EMB_DIM), 0.01)
    for l in range(ENC_LAYERS):
        # conv weights pre-flattened to im2col form [K*Cin, 2H] (tap k slowest)
        p[f"enc_conv_w_{l}"] = nrm(next(ki), (KERNEL_SIZE * HID_DIM, 2 * HID_DIM))
        p[f"enc_conv_b_{l}"] = nrm(next(ki), (1, 2 * HID_DIM), 0.01)
    # decoder
    p["dec_tok_emb"] = nrm(next(ki), (OUTPUT_DIM, EMB_DIM), 0.1)
    p["dec_pos_emb"] = nrm(next(ki), (MAX_LEN, EMB_DIM), 0.1)
    p["dec_emb2hid_w"] = nrm(next(ki), (EMB_DIM, HID_DIM))
    p["dec_emb2hid_b"] = nrm(next(ki), (1, HID_DIM), 0.01)
    p["dec_hid2emb_w"] = nrm(next(ki), (HID_DIM, EMB_DIM))
    p["dec_hid2emb_b"] = nrm(next(ki), (1, EMB_DIM), 0.01)
    p["attn_hid2emb_w"] = nrm(next(ki), (HID_DIM, EMB_DIM))
    p["attn_hid2emb_b"] = nrm(next(ki), (1, EMB_DIM), 0.01)
    p["attn_emb2hid_w"] = nrm(next(ki), (EMB_DIM, HID_DIM))
    p["attn_emb2hid_b"] = nrm(next(ki), (1, HID_DIM), 0.01)
    for l in range(DEC_LAYERS):
        p[f"dec_conv_w_{l}"] = nrm(next(ki), (KERNEL_SIZE * HID_DIM, 2 * HID_DIM))
        p[f"dec_conv_b_{l}"] = nrm(next(ki), (1, 2 * HID_DIM), 0.01)
    p["fc_out_w"] = nrm(next(ki), (EMB_DIM, OUTPUT_DIM))
    p["fc_out_b"] = nrm(next(ki), (1, OUTPUT_DIM), 0.01)
    return p


def pack_params(raw):
    """Pack all weights/biases into one f32 [SLAB_ROWS, 128] slab (zero-padded)."""
    slab = jnp.zeros((SLAB_ROWS, SLAB_LANES), jnp.float32)
    for name, (off, _rows, _cols) in SLAB_LAYOUT.items():
        a = jnp.asarray(raw[name], jnp.float32)
        r, c = a.shape
        slab = slab.at[off:off + r, :c].set(a)
    return slab


# ------------------------------------ main -------------------------------------
if __name__ == "__main__":
    key = jax.random.PRNGKey(0)
    kp, ks, kt = jax.random.split(key, 3)
    slab = pack_params(init_raw_params(kp))

    src = jax.random.randint(ks, (BATCH, SRC_LEN), 0, INPUT_DIM, dtype=jnp.int32)
    trg = jax.random.randint(kt, (BATCH, TRG_LEN), 0, OUTPUT_DIM, dtype=jnp.int32)

    fwd = jax.jit(seq2seq_cnn_forward)
    output, attention = fwd(src, trg, slab)
    jax.block_until_ready((output, attention))

    assert output.shape == (BATCH, TRG_LEN, OUTPUT_DIM)
    assert attention.shape == (BATCH, TRG_LEN, SRC_LEN)
    print("KERNEL_OK")
</pallas_src>

<mosaic_0001>
module attributes {stable_mosaic.version = 11 : i64} {
  func.func @_seq2seq_kernel(%arg0: i32, %arg1: memref<1x8x1xi32, #tpu.memory_space<vmem>>, %arg2: memref<1x8x1xi32, #tpu.memory_space<vmem>>, %arg3: memref<1112x128xf32, #tpu.memory_space<vmem>>, %arg4: memref<1x8x128xf32, #tpu.memory_space<vmem>>, %arg5: memref<1x8x128xf32, #tpu.memory_space<vmem>>) attributes {dimension_semantics = [#tpu.dimension_semantics<parallel>], iteration_bounds = array<i64: 2>, scalar_prefetch = 0 : i64, scratch_operands = 0 : i64, tpu.core_type = #tpu.core_type<tc>, window_params = [{transform_indices = @transform_0, window_bounds = array<i64: 1, 8, 1>}, {transform_indices = @transform_1, window_bounds = array<i64: 1, 8, 1>}, {pipeline_mode = #tpu.pipeline_mode<synchronous>, transform_indices = @transform_2, window_bounds = array<i64: 1112, 128>}, {transform_indices = @transform_3, window_bounds = array<i64: 1, 8, 128>}, {transform_indices = @transform_4, window_bounds = array<i64: 1, 8, 128>}]} {
    %c0 = arith.constant 0 : index
    %c0_0 = arith.constant 0 : index
    %c0_1 = arith.constant 0 : index
    %0 = vector.load %arg1[%c0, %c0_0, %c0_1] : memref<1x8x1xi32, #tpu.memory_space<vmem>>, vector<1x8x1xi32>
    %c0_2 = arith.constant 0 : index
    %c0_3 = arith.constant 0 : index
    %1 = vector.load %arg3[%c0_2, %c0_3] : memref<1112x128xf32, #tpu.memory_space<vmem>>, vector<128x32xf32>
    %c128 = arith.constant 128 : index
    %c0_4 = arith.constant 0 : index
    %2 = vector.load %arg3[%c128, %c0_4] : memref<1112x128xf32, #tpu.memory_space<vmem>>, vector<16x32xf32>
    %3 = tpu.iota {dimensions = array<i32: 2>} : vector<1x8x128xi32>
    %4 = vector.broadcast %0 : vector<1x8x1xi32> to vector<1x8x128xi32>
    %5 = arith.cmpi eq, %3, %4 : vector<1x8x128xi32>
    %6 = arith.extui %5 : vector<1x8x128xi1> to vector<1x8x128xi32>
    %7 = arith.sitofp %6 : vector<1x8x128xi32> to vector<1x8x128xf32>
    %8 = arith.truncf %7 : vector<1x8x128xf32> to vector<1x8x128xbf16>
    %9 = vector.shape_cast %8 : vector<1x8x128xbf16> to vector<8x128xbf16>
    %10 = arith.truncf %1 : vector<128x32xf32> to vector<128x32xbf16>
    %cst = arith.constant dense<0.000000e+00> : vector<8x32xf32>
    %11 = tpu.matmul %9, %10, %cst {dimension_numbers = #tpu.dot_dimension_numbers<[1], [0], [0], [1], [0, 0, 1, 1], [], []>} : vector<8x128xbf16>, vector<128x32xbf16>, vector<8x32xf32> -> vector<8x32xf32>
    %12 = vector.shape_cast %11 : vector<8x32xf32> to vector<1x8x32xf32>
    %13 = vector.extract_strided_slice %2 {offsets = [0, 0], sizes = [8, 32], strides = [1, 1]} : vector<16x32xf32> to vector<8x32xf32>
    %14 = vector.shape_cast %13 : vector<8x32xf32> to vector<1x8x32xf32>
    %15 = arith.addf %12, %14 : vector<1x8x32xf32>
    %c144 = arith.constant 144 : index
    %c0_5 = arith.constant 0 : index
    %16 = vector.load %arg3[%c144, %c0_5] : memref<1112x128xf32, #tpu.memory_space<vmem>>, vector<32x32xf32>
    %17 = vector.shape_cast %15 : vector<1x8x32xf32> to vector<8x32xf32>
    %18 = arith.truncf %17 : vector<8x32xf32> to vector<8x32xbf16>
    %19 = arith.truncf %16 : vector<32x32xf32> to vector<32x32xbf16>
    %cst_6 = arith.constant dense<0.000000e+00> : vector<8x32xf32>
    %20 = tpu.matmul %18, %19, %cst_6 {dimension_numbers = #tpu.dot_dimension_numbers<[1], [0], [0], [1], [0, 0, 1, 1], [], []>} : vector<8x32xbf16>, vector<32x32xbf16>, vector<8x32xf32> -> vector<8x32xf32>
    %21 = vector.shape_cast %20 : vector<8x32xf32> to vector<1x8x32xf32>
    %c176 = arith.constant 176 : index
    %c0_7 = arith.constant 0 : index
    %22 = vector.load %arg3[%c176, %c0_7] : memref<1112x128xf32, #tpu.memory_space<vmem>>, vector<1x32xf32>
    %23 = vector.shape_cast %22 : vector<1x32xf32> to vector<1x1x32xf32>
    %24 = vector.broadcast %23 : vector<1x1x32xf32> to vector<1x8x32xf32>
    %25 = arith.addf %21, %24 : vector<1x8x32xf32>
    %c224 = arith.constant 224 : index
    %c0_8 = arith.constant 0 : index
    %26 = vector.load %arg3[%c224, %c0_8] : memref<1112x128xf32, #tpu.memory_space<vmem>>, vector<128x64xf32>
    %c352 = arith.constant 352 : index
    %c0_9 = arith.constant 0 : index
    %27 = vector.load %arg3[%c352, %c0_9] : memref<1112x128xf32, #tpu.memory_space<vmem>>, vector<1x64xf32>
    %cst_10 = arith.constant 0.000000e+00 : f32
    %28 = vector.broadcast %cst_10 : f32 to vector<1x1x32xf32>
    %29 = tpu.concatenate %28, %25, %28 in 1 : vector<1x1x32xf32>, vector<1x8x32xf32>, vector<1x1x32xf32> -> vector<1x10x32xf32>
    %30 = vector.extract_strided_slice %29 {offsets = [0, 0, 0], sizes = [1, 8, 32], strides = [1, 1, 1]} : vector<1x10x32xf32> to vector<1x8x32xf32>
    %31 = vector.extract_strided_slice %29 {offsets = [0, 1, 0], sizes = [1, 8, 32], strides = [1, 1, 1]} : vector<1x10x32xf32> to vector<1x8x32xf32>
    %32 = vector.extract_strided_slice %29 {offsets = [0, 2, 0], sizes = [1, 8, 32], strides = [1, 1, 1]} : vector<1x10x32xf32> to vector<1x8x32xf32>
    %cst_11 = arith.constant 0.000000e+00 : f32
    %33 = vector.broadcast %cst_11 : f32 to vector<1x8x32xf32>
    %34 = tpu.concatenate %30, %31, %32, %33 in 2 : vector<1x8x32xf32>, vector<1x8x32xf32>, vector<1x8x32xf32>, vector<1x8x32xf32> -> vector<1x8x128xf32>
    %35 = vector.shape_cast %34 : vector<1x8x128xf32> to vector<8x128xf32>
    %36 = arith.truncf %35 : vector<8x128xf32> to vector<8x128xbf16>
    %37 = arith.truncf %26 : vector<128x64xf32> to vector<128x64xbf16>
    %cst_12 = arith.constant dense<0.000000e+00> : vector<8x64xf32>
    %38 = tpu.matmul %36, %37, %cst_12 {dimension_numbers = #tpu.dot_dimension_numbers<[1], [0], [0], [1], [0, 0, 1, 1], [], []>} : vector<8x128xbf16>, vector<128x64xbf16>, vector<8x64xf32> -> vector<8x64xf32>
    %39 = vector.shape_cast %38 : vector<8x64xf32> to vector<1x8x64xf32>
    %40 = vector.shape_cast %27 : vector<1x64xf32> to vector<1x1x64xf32>
    %41 = vector.broadcast %40 : vector<1x1x64xf32> to vector<1x8x64xf32>
    %42 = arith.addf %39, %41 : vector<1x8x64xf32>
    %43 = vector.extract_strided_slice %42 {offsets = [0, 0, 0], sizes = [1, 8, 32], strides = [1, 1, 1]} : vector<1x8x64xf32> to vector<1x8x32xf32>
    %44 = vector.extract_strided_slice %42 {offsets = [0, 0, 32], sizes = [1, 8, 32], strides = [1, 1, 1]} : vector<1x8x64xf32> to vector<1x8x32xf32>
    %45 = arith.negf %44 : vector<1x8x32xf32>
    %46 = math.exp %45 : vector<1x8x32xf32>
    %cst_13 = arith.constant 1.000000e+00 : f32
    %47 = vector.broadcast %cst_13 : f32 to vector<1x8x32xf32>
    %48 = arith.addf %47, %46 : vector<1x8x32xf32>
    %49 = arith.divf %47, %48 : vector<1x8x32xf32>
    %50 = arith.mulf %43, %49 : vector<1x8x32xf32>
    %51 = arith.addf %50, %25 : vector<1x8x32xf32>
    %cst_14 = arith.constant 0.707106769 : f32
    %52 = vector.broadcast %cst_14 : f32 to vector<1x8x32xf32>
    %53 = arith.mulf %51, %52 : vector<1x8x32xf32>
    %c360 = arith.constant 360 : index
    %c0_15 = arith.constant 0 : index
    %54 = vector.load %arg3[%c360, %c0_15] : memref<1112x128xf32, #tpu.memory_space<vmem>>, vector<128x64xf32>
    %c488 = arith.constant 488 : index
    %c0_16 = arith.constant 0 : index
    %55 = vector.load %arg3[%c488, %c0_16] : memref<1112x128xf32, #tpu.memory_space<vmem>>, vector<1x64xf32>
    %cst_17 = arith.constant 0.000000e+00 : f32
    %56 = vector.broadcast %cst_17 : f32 to vector<1x1x32xf32>
    %57 = tpu.concatenate %56, %53, %56 in 1 : vector<1x1x32xf32>, vector<1x8x32xf32>, vector<1x1x32xf32> -> vector<1x10x32xf32>
    %58 = vector.extract_strided_slice %57 {offsets = [0, 0, 0], sizes = [1, 8, 32], strides = [1, 1, 1]} : vector<1x10x32xf32> to vector<1x8x32xf32>
    %59 = vector.extract_strided_slice %57 {offsets = [0, 1, 0], sizes = [1, 8, 32], strides = [1, 1, 1]} : vector<1x10x32xf32> to vector<1x8x32xf32>
    %60 = vector.extract_strided_slice %57 {offsets = [0, 2, 0], sizes = [1, 8, 32], strides = [1, 1, 1]} : vector<1x10x32xf32> to vector<1x8x32xf32>
    %cst_18 = arith.constant 0.000000e+00 : f32
    %61 = vector.broadcast %cst_18 : f32 to vector<1x8x32xf32>
    %62 = tpu.concatenate %58, %59, %60, %61 in 2 : vector<1x8x32xf32>, vector<1x8x32xf32>, vector<1x8x32xf32>, vector<1x8x32xf32> -> vector<1x8x128xf32>
    %63 = vector.shape_cast %62 : vector<1x8x128xf32> to vector<8x128xf32>
    %64 = arith.truncf %63 : vector<8x128xf32> to vector<8x128xbf16>
    %65 = arith.truncf %54 : vector<128x64xf32> to vector<128x64xbf16>
    %cst_19 = arith.constant dense<0.000000e+00> : vector<8x64xf32>
    %66 = tpu.matmul %64, %65, %cst_19 {dimension_numbers = #tpu.dot_dimension_numbers<[1], [0], [0], [1], [0, 0, 1, 1], [], []>} : vector<8x128xbf16>, vector<128x64xbf16>, vector<8x64xf32> -> vector<8x64xf32>
    %67 = vector.shape_cast %66 : vector<8x64xf32> to vector<1x8x64xf32>
    %68 = vector.shape_cast %55 : vector<1x64xf32> to vector<1x1x64xf32>
    %69 = vector.broadcast %68 : vector<1x1x64xf32> to vector<1x8x64xf32>
    %70 = arith.addf %67, %69 : vector<1x8x64xf32>
    %71 = vector.extract_strided_slice %70 {offsets = [0, 0, 0], sizes = [1, 8, 32], strides = [1, 1, 1]} : vector<1x8x64xf32> to vector<1x8x32xf32>
    %72 = vector.extract_strided_slice %70 {offsets = [0, 0, 32], sizes = [1, 8, 32], strides = [1, 1, 1]} : vector<1x8x64xf32> to vector<1x8x32xf32>
    %73 = arith.negf %72 : vector<1x8x32xf32>
    %74 = math.exp %73 : vector<1x8x32xf32>
    %cst_20 = arith.constant 1.000000e+00 : f32
    %75 = vector.broadcast %cst_20 : f32 to vector<1x8x32xf32>
    %76 = arith.addf %75, %74 : vector<1x8x32xf32>
    %77 = arith.divf %75, %76 : vector<1x8x32xf32>
    %78 = arith.mulf %71, %77 : vector<1x8x32xf32>
    %79 = arith.addf %78, %53 : vector<1x8x32xf32>
    %cst_21 = arith.constant 0.707106769 : f32
    %80 = vector.broadcast %cst_21 : f32 to vector<1x8x32xf32>
    %81 = arith.mulf %79, %80 : vector<1x8x32xf32>
    %c184 = arith.constant 184 : index
    %c0_22 = arith.constant 0 : index
    %82 = vector.load %arg3[%c184, %c0_22] : memref<1112x128xf32, #tpu.memory_space<vmem>>, vector<32x32xf32>
    %83 = vector.shape_cast %81 : vector<1x8x32xf32> to vector<8x32xf32>
    %84 = arith.truncf %83 : vector<8x32xf32> to vector<8x32xbf16>
    %85 = arith.truncf %82 : vector<32x32xf32> to vector<32x32xbf16>
    %cst_23 = arith.constant dense<0.000000e+00> : vector<8x32xf32>
    %86 = tpu.matmul %84, %85, %cst_23 {dimension_numbers = #tpu.dot_dimension_numbers<[1], [0], [0], [1], [0, 0, 1, 1], [], []>} : vector<8x32xbf16>, vector<32x32xbf16>, vector<8x32xf32> -> vector<8x32xf32>
    %87 = vector.shape_cast %86 : vector<8x32xf32> to vector<1x8x32xf32>
    %c216 = arith.constant 216 : index
    %c0_24 = arith.constant 0 : index
    %88 = vector.load %arg3[%c216, %c0_24] : memref<1112x128xf32, #tpu.memory_space<vmem>>, vector<1x32xf32>
    %89 = vector.shape_cast %88 : vector<1x32xf32> to vector<1x1x32xf32>
    %90 = vector.broadcast %89 : vector<1x1x32xf32> to vector<1x8x32xf32>
    %91 = arith.addf %87, %90 : vector<1x8x32xf32>
    %92 = arith.addf %91, %15 : vector<1x8x32xf32>
    %cst_25 = arith.constant 0.707106769 : f32
    %93 = vector.broadcast %cst_25 : f32 to vector<1x8x32xf32>
    %94 = arith.mulf %92, %93 : vector<1x8x32xf32>
    %c0_26 = arith.constant 0 : index
    %c0_27 = arith.constant 0 : index
    %c0_28 = arith.constant 0 : index
    %95 = vector.load %arg2[%c0_26, %c0_27, %c0_28] : memref<1x8x1xi32, #tpu.memory_space<vmem>>, vector<1x8x1xi32>
    %c496 = arith.constant 496 : index
    %c0_29 = arith.constant 0 : index
    %96 = vector.load %arg3[%c496, %c0_29] : memref<1112x128xf32, #tpu.memory_space<vmem>>, vector<128x32xf32>
    %c624 = arith.constant 624 : index
    %c0_30 = arith.constant 0 : index
    %97 = vector.load %arg3[%c624, %c0_30] : memref<1112x128xf32, #tpu.memory_space<vmem>>, vector<16x32xf32>
    %98 = tpu.iota {dimensions = array<i32: 2>} : vector<1x8x128xi32>
    %99 = vector.broadcast %95 : vector<1x8x1xi32> to vector<1x8x128xi32>
    %100 = arith.cmpi eq, %98, %99 : vector<1x8x128xi32>
    %101 = arith.extui %100 : vector<1x8x128xi1> to vector<1x8x128xi32>
    %102 = arith.sitofp %101 : vector<1x8x128xi32> to vector<1x8x128xf32>
    %103 = arith.truncf %102 : vector<1x8x128xf32> to vector<1x8x128xbf16>
    %104 = vector.shape_cast %103 : vector<1x8x128xbf16> to vector<8x128xbf16>
    %105 = arith.truncf %96 : vector<128x32xf32> to vector<128x32xbf16>
    %cst_31 = arith.constant dense<0.000000e+00> : vector<8x32xf32>
    %106 = tpu.matmul %104, %105, %cst_31 {dimension_numbers = #tpu.dot_dimension_numbers<[1], [0], [0], [1], [0, 0, 1, 1], [], []>} : vector<8x128xbf16>, vector<128x32xbf16>, vector<8x32xf32> -> vector<8x32xf32>
    %107 = vector.shape_cast %106 : vector<8x32xf32> to vector<1x8x32xf32>
    %108 = vector.extract_strided_slice %97 {offsets = [0, 0], sizes = [8, 32], strides = [1, 1]} : vector<16x32xf32> to vector<8x32xf32>
    %109 = vector.shape_cast %108 : vector<8x32xf32> to vector<1x8x32xf32>
    %110 = arith.addf %107, %109 : vector<1x8x32xf32>
    %c640 = arith.constant 640 : index
    %c0_32 = arith.constant 0 : index
    %111 = vector.load %arg3[%c640, %c0_32] : memref<1112x128xf32, #tpu.memory_space<vmem>>, vector<32x32xf32>
    %112 = vector.shape_cast %110 : vector<1x8x32xf32> to vector<8x32xf32>
    %113 = arith.truncf %112 : vector<8x32xf32> to vector<8x32xbf16>
    %114 = arith.truncf %111 : vector<32x32xf32> to vector<32x32xbf16>
    %cst_33 = arith.constant dense<0.000000e+00> : vector<8x32xf32>
    %115 = tpu.matmul %113, %114, %cst_33 {dimension_numbers = #tpu.dot_dimension_numbers<[1], [0], [0], [1], [0, 0, 1, 1], [], []>} : vector<8x32xbf16>, vector<32x32xbf16>, vector<8x32xf32> -> vector<8x32xf32>
    %116 = vector.shape_cast %115 : vector<8x32xf32> to vector<1x8x32xf32>
    %c672 = arith.constant 672 : index
    %c0_34 = arith.constant 0 : index
    %117 = vector.load %arg3[%c672, %c0_34] : memref<1112x128xf32, #tpu.memory_space<vmem>>, vector<1x32xf32>
    %118 = vector.shape_cast %117 : vector<1x32xf32> to vector<1x1x32xf32>
    %119 = vector.broadcast %118 : vector<1x1x32xf32> to vector<1x8x32xf32>
    %120 = arith.addf %116, %119 : vector<1x8x32xf32>
    %121 = arith.truncf %91 : vector<1x8x32xf32> to vector<1x8x32xbf16>
    %122 = arith.truncf %94 : vector<1x8x32xf32> to vector<1x8x32xbf16>
    %c800 = arith.constant 800 : index
    %c0_35 = arith.constant 0 : index
    %123 = vector.load %arg3[%c800, %c0_35] : memref<1112x128xf32, #tpu.memory_space<vmem>>, vector<128x64xf32>
    %c928 = arith.constant 928 : index
    %c0_36 = arith.constant 0 : index
    %124 = vector.load %arg3[%c928, %c0_36] : memref<1112x128xf32, #tpu.memory_space<vmem>>, vector<1x64xf32>
    %cst_37 = arith.constant 1.000000e+00 : f32
    %125 = vector.broadcast %cst_37 : f32 to vector<1x2x32xf32>
    %126 = tpu.concatenate %125, %120 in 1 : vector<1x2x32xf32>, vector<1x8x32xf32> -> vector<1x10x32xf32>
    %127 = vector.extract_strided_slice %126 {offsets = [0, 0, 0], sizes = [1, 8, 32], strides = [1, 1, 1]} : vector<1x10x32xf32> to vector<1x8x32xf32>
    %128 = vector.extract_strided_slice %126 {offsets = [0, 1, 0], sizes = [1, 8, 32], strides = [1, 1, 1]} : vector<1x10x32xf32> to vector<1x8x32xf32>
    %129 = vector.extract_strided_slice %126 {offsets = [0, 2, 0], sizes = [1, 8, 32], strides = [1, 1, 1]} : vector<1x10x32xf32> to vector<1x8x32xf32>
    %cst_38 = arith.constant 0.000000e+00 : f32
    %130 = vector.broadcast %cst_38 : f32 to vector<1x8x32xf32>
    %131 = tpu.concatenate %127, %128, %129, %130 in 2 : vector<1x8x32xf32>, vector<1x8x32xf32>, vector<1x8x32xf32>, vector<1x8x32xf32> -> vector<1x8x128xf32>
    %132 = vector.shape_cast %131 : vector<1x8x128xf32> to vector<8x128xf32>
    %133 = arith.truncf %132 : vector<8x128xf32> to vector<8x128xbf16>
    %134 = arith.truncf %123 : vector<128x64xf32> to vector<128x64xbf16>
    %cst_39 = arith.constant dense<0.000000e+00> : vector<8x64xf32>
    %135 = tpu.matmul %133, %134, %cst_39 {dimension_numbers = #tpu.dot_dimension_numbers<[1], [0], [0], [1], [0, 0, 1, 1], [], []>} : vector<8x128xbf16>, vector<128x64xbf16>, vector<8x64xf32> -> vector<8x64xf32>
    %136 = vector.shape_cast %135 : vector<8x64xf32> to vector<1x8x64xf32>
    %137 = vector.shape_cast %124 : vector<1x64xf32> to vector<1x1x64xf32>
    %138 = vector.broadcast %137 : vector<1x1x64xf32> to vector<1x8x64xf32>
    %139 = arith.addf %136, %138 : vector<1x8x64xf32>
    %140 = vector.extract_strided_slice %139 {offsets = [0, 0, 0], sizes = [1, 8, 32], strides = [1, 1, 1]} : vector<1x8x64xf32> to vector<1x8x32xf32>
    %141 = vector.extract_strided_slice %139 {offsets = [0, 0, 32], sizes = [1, 8, 32], strides = [1, 1, 1]} : vector<1x8x64xf32> to vector<1x8x32xf32>
    %142 = arith.negf %141 : vector<1x8x32xf32>
    %143 = math.exp %142 : vector<1x8x32xf32>
    %cst_40 = arith.constant 1.000000e+00 : f32
    %144 = vector.broadcast %cst_40 : f32 to vector<1x8x32xf32>
    %145 = arith.addf %144, %143 : vector<1x8x32xf32>
    %146 = arith.divf %144, %145 : vector<1x8x32xf32>
    %147 = arith.mulf %140, %146 : vector<1x8x32xf32>
    %c720 = arith.constant 720 : index
    %c0_41 = arith.constant 0 : index
    %148 = vector.load %arg3[%c720, %c0_41] : memref<1112x128xf32, #tpu.memory_space<vmem>>, vector<32x32xf32>
    %149 = vector.shape_cast %147 : vector<1x8x32xf32> to vector<8x32xf32>
    %150 = arith.truncf %149 : vector<8x32xf32> to vector<8x32xbf16>
    %151 = arith.truncf %148 : vector<32x32xf32> to vector<32x32xbf16>
    %cst_42 = arith.constant dense<0.000000e+00> : vector<8x32xf32>
    %152 = tpu.matmul %150, %151, %cst_42 {dimension_numbers = #tpu.dot_dimension_numbers<[1], [0], [0], [1], [0, 0, 1, 1], [], []>} : vector<8x32xbf16>, vector<32x32xbf16>, vector<8x32xf32> -> vector<8x32xf32>
    %153 = vector.shape_cast %152 : vector<8x32xf32> to vector<1x8x32xf32>
    %c752 = arith.constant 752 : index
    %c0_43 = arith.constant 0 : index
    %154 = vector.load %arg3[%c752, %c0_43] : memref<1112x128xf32, #tpu.memory_space<vmem>>, vector<1x32xf32>
    %155 = vector.shape_cast %154 : vector<1x32xf32> to vector<1x1x32xf32>
    %156 = vector.broadcast %155 : vector<1x1x32xf32> to vector<1x8x32xf32>
    %157 = arith.addf %153, %156 : vector<1x8x32xf32>
    %158 = arith.addf %157, %110 : vector<1x8x32xf32>
    %cst_44 = arith.constant 0.707106769 : f32
    %159 = vector.broadcast %cst_44 : f32 to vector<1x8x32xf32>
    %160 = arith.mulf %158, %159 : vector<1x8x32xf32>
    %161 = arith.truncf %160 : vector<1x8x32xf32> to vector<1x8x32xbf16>
    "tpu.trace_start"() <{level = 10 : i32, message = "bte,bse->bts"}> : () -> ()
    %cst_45 = arith.constant dense<0.000000e+00> : vector<1x8x8xf32>
    %162 = tpu.matmul %161, %121, %cst_45 {dimension_numbers = #tpu.dot_dimension_numbers<[2], [2], [1], [1], [0, 0, 0, 1, 1, 1], [0], [0]>} : vector<1x8x32xbf16>, vector<1x8x32xbf16>, vector<1x8x8xf32> -> vector<1x8x8xf32>
    "tpu.trace_stop"() : () -> ()
    %cst_46 = arith.constant dense<0xFF800000> : vector<1x8xf32>
    %163 = vector.multi_reduction <maximumf>, %162, %cst_46 [2] : vector<1x8x8xf32> to vector<1x8xf32>
    %164 = vector.shape_cast %163 : vector<1x8xf32> to vector<1x8x1xf32>
    %165 = vector.broadcast %164 : vector<1x8x1xf32> to vector<1x8x8xf32>
    %166 = arith.subf %162, %165 : vector<1x8x8xf32>
    %167 = math.exp %166 : vector<1x8x8xf32>
    %cst_47 = arith.constant dense<0.000000e+00> : vector<1x8xf32>
    %168 = vector.multi_reduction <add>, %167, %cst_47 [2] : vector<1x8x8xf32> to vector<1x8xf32>
    %169 = vector.shape_cast %168 : vector<1x8xf32> to vector<1x8x1xf32>
    %170 = tpu.reciprocal %169 {approx = true} : vector<1x8x1xf32> -> vector<1x8x1xf32>
    %171 = vector.broadcast %170 : vector<1x8x1xf32> to vector<1x8x8xf32>
    %172 = arith.mulf %167, %171 : vector<1x8x8xf32>
    %173 = arith.truncf %172 : vector<1x8x8xf32> to vector<1x8x8xbf16>
    "tpu.trace_start"() <{level = 10 : i32, message = "bts,bse->bte"}> : () -> ()
    %cst_48 = arith.constant dense<0.000000e+00> : vector<1x8x32xf32>
    %174 = tpu.matmul %173, %122, %cst_48 {dimension_numbers = #tpu.dot_dimension_numbers<[2], [1], [1], [2], [0, 0, 0, 1, 1, 2], [0], [0]>} : vector<1x8x8xbf16>, vector<1x8x32xbf16>, vector<1x8x32xf32> -> vector<1x8x32xf32>
    "tpu.trace_stop"() : () -> ()
    %c760 = arith.constant 760 : index
    %c0_49 = arith.constant 0 : index
    %175 = vector.load %arg3[%c760, %c0_49] : memref<1112x128xf32, #tpu.memory_space<vmem>>, vector<32x32xf32>
    %176 = vector.shape_cast %174 : vector<1x8x32xf32> to vector<8x32xf32>
    %177 = arith.truncf %176 : vector<8x32xf32> to vector<8x32xbf16>
    %178 = arith.truncf %175 : vector<32x32xf32> to vector<32x32xbf16>
    %cst_50 = arith.constant dense<0.000000e+00> : vector<8x32xf32>
    %179 = tpu.matmul %177, %178, %cst_50 {dimension_numbers = #tpu.dot_dimension_numbers<[1], [0], [0], [1], [0, 0, 1, 1], [], []>} : vector<8x32xbf16>, vector<32x32xbf16>, vector<8x32xf32> -> vector<8x32xf32>
    %180 = vector.shape_cast %179 : vector<8x32xf32> to vector<1x8x32xf32>
    %c792 = arith.constant 792 : index
    %c0_51 = arith.constant 0 : index
    %181 = vector.load %arg3[%c792, %c0_51] : memref<1112x128xf32, #tpu.memory_space<vmem>>, vector<1x32xf32>
    %182 = vector.shape_cast %181 : vector<1x32xf32> to vector<1x1x32xf32>
    %183 = vector.broadcast %182 : vector<1x1x32xf32> to vector<1x8x32xf32>
    %184 = arith.addf %180, %183 : vector<1x8x32xf32>
    %185 = arith.addf %147, %184 : vector<1x8x32xf32>
    %cst_52 = arith.constant 0.707106769 : f32
    %186 = vector.broadcast %cst_52 : f32 to vector<1x8x32xf32>
    %187 = arith.mulf %185, %186 : vector<1x8x32xf32>
    %188 = arith.addf %187, %120 : vector<1x8x32xf32>
    %cst_53 = arith.constant 0.707106769 : f32
    %189 = vector.broadcast %cst_53 : f32 to vector<1x8x32xf32>
    %190 = arith.mulf %188, %189 : vector<1x8x32xf32>
    %c936 = arith.constant 936 : index
    %c0_54 = arith.constant 0 : index
    %191 = vector.load %arg3[%c936, %c0_54] : memref<1112x128xf32, #tpu.memory_space<vmem>>, vector<128x64xf32>
    %c1064 = arith.constant 1064 : index
    %c0_55 = arith.constant 0 : index
    %192 = vector.load %arg3[%c1064, %c0_55] : memref<1112x128xf32, #tpu.memory_space<vmem>>, vector<1x64xf32>
    %cst_56 = arith.constant 1.000000e+00 : f32
    %193 = vector.broadcast %cst_56 : f32 to vector<1x2x32xf32>
    %194 = tpu.concatenate %193, %190 in 1 : vector<1x2x32xf32>, vector<1x8x32xf32> -> vector<1x10x32xf32>
    %195 = vector.extract_strided_slice %194 {offsets = [0, 0, 0], sizes = [1, 8, 32], strides = [1, 1, 1]} : vector<1x10x32xf32> to vector<1x8x32xf32>
    %196 = vector.extract_strided_slice %194 {offsets = [0, 1, 0], sizes = [1, 8, 32], strides = [1, 1, 1]} : vector<1x10x32xf32> to vector<1x8x32xf32>
    %197 = vector.extract_strided_slice %194 {offsets = [0, 2, 0], sizes = [1, 8, 32], strides = [1, 1, 1]} : vector<1x10x32xf32> to vector<1x8x32xf32>
    %cst_57 = arith.constant 0.000000e+00 : f32
    %198 = vector.broadcast %cst_57 : f32 to vector<1x8x32xf32>
    %199 = tpu.concatenate %195, %196, %197, %198 in 2 : vector<1x8x32xf32>, vector<1x8x32xf32>, vector<1x8x32xf32>, vector<1x8x32xf32> -> vector<1x8x128xf32>
    %200 = vector.shape_cast %199 : vector<1x8x128xf32> to vector<8x128xf32>
    %201 = arith.truncf %200 : vector<8x128xf32> to vector<8x128xbf16>
    %202 = arith.truncf %191 : vector<128x64xf32> to vector<128x64xbf16>
    %cst_58 = arith.constant dense<0.000000e+00> : vector<8x64xf32>
    %203 = tpu.matmul %201, %202, %cst_58 {dimension_numbers = #tpu.dot_dimension_numbers<[1], [0], [0], [1], [0, 0, 1, 1], [], []>} : vector<8x128xbf16>, vector<128x64xbf16>, vector<8x64xf32> -> vector<8x64xf32>
    %204 = vector.shape_cast %203 : vector<8x64xf32> to vector<1x8x64xf32>
    %205 = vector.shape_cast %192 : vector<1x64xf32> to vector<1x1x64xf32>
    %206 = vector.broadcast %205 : vector<1x1x64xf32> to vector<1x8x64xf32>
    %207 = arith.addf %204, %206 : vector<1x8x64xf32>
    %208 = vector.extract_strided_slice %207 {offsets = [0, 0, 0], sizes = [1, 8, 32], strides = [1, 1, 1]} : vector<1x8x64xf32> to vector<1x8x32xf32>
    %209 = vector.extract_strided_slice %207 {offsets = [0, 0, 32], sizes = [1, 8, 32], strides = [1, 1, 1]} : vector<1x8x64xf32> to vector<1x8x32xf32>
    %210 = arith.negf %209 : vector<1x8x32xf32>
    %211 = math.exp %210 : vector<1x8x32xf32>
    %cst_59 = arith.constant 1.000000e+00 : f32
    %212 = vector.broadcast %cst_59 : f32 to vector<1x8x32xf32>
    %213 = arith.addf %212, %211 : vector<1x8x32xf32>
    %214 = arith.divf %212, %213 : vector<1x8x32xf32>
    %215 = arith.mulf %208, %214 : vector<1x8x32xf32>
    %c720_60 = arith.constant 720 : index
    %c0_61 = arith.constant 0 : index
    %216 = vector.load %arg3[%c720_60, %c0_61] : memref<1112x128xf32, #tpu.memory_space<vmem>>, vector<32x32xf32>
    %217 = vector.shape_cast %215 : vector<1x8x32xf32> to vector<8x32xf32>
    %218 = arith.truncf %217 : vector<8x32xf32> to vector<8x32xbf16>
    %219 = arith.truncf %216 : vector<32x32xf32> to vector<32x32xbf16>
    %cst_62 = arith.constant dense<0.000000e+00> : vector<8x32xf32>
    %220 = tpu.matmul %218, %219, %cst_62 {dimension_numbers = #tpu.dot_dimension_numbers<[1], [0], [0], [1], [0, 0, 1, 1], [], []>} : vector<8x32xbf16>, vector<32x32xbf16>, vector<8x32xf32> -> vector<8x32xf32>
    %221 = vector.shape_cast %220 : vector<8x32xf32> to vector<1x8x32xf32>
    %c752_63 = arith.constant 752 : index
    %c0_64 = arith.constant 0 : index
    %222 = vector.load %arg3[%c752_63, %c0_64] : memref<1112x128xf32, #tpu.memory_space<vmem>>, vector<1x32xf32>
    %223 = vector.shape_cast %222 : vector<1x32xf32> to vector<1x1x32xf32>
    %224 = vector.broadcast %223 : vector<1x1x32xf32> to vector<1x8x32xf32>
    %225 = arith.addf %221, %224 : vector<1x8x32xf32>
    %226 = arith.addf %225, %110 : vector<1x8x32xf32>
    %cst_65 = arith.constant 0.707106769 : f32
    %227 = vector.broadcast %cst_65 : f32 to vector<1x8x32xf32>
    %228 = arith.mulf %226, %227 : vector<1x8x32xf32>
    %229 = arith.truncf %228 : vector<1x8x32xf32> to vector<1x8x32xbf16>
    "tpu.trace_start"() <{level = 10 : i32, message = "bte,bse->bts"}> : () -> ()
    %cst_66 = arith.constant dense<0.000000e+00> : vector<1x8x8xf32>
    %230 = tpu.matmul %229, %121, %cst_66 {dimension_numbers = #tpu.dot_dimension_numbers<[2], [2], [1], [1], [0, 0, 0, 1, 1, 1], [0], [0]>} : vector<1x8x32xbf16>, vector<1x8x32xbf16>, vector<1x8x8xf32> -> vector<1x8x8xf32>
    "tpu.trace_stop"() : () -> ()
    %cst_67 = arith.constant dense<0xFF800000> : vector<1x8xf32>
    %231 = vector.multi_reduction <maximumf>, %230, %cst_67 [2] : vector<1x8x8xf32> to vector<1x8xf32>
    %232 = vector.shape_cast %231 : vector<1x8xf32> to vector<1x8x1xf32>
    %233 = vector.broadcast %232 : vector<1x8x1xf32> to vector<1x8x8xf32>
    %234 = arith.subf %230, %233 : vector<1x8x8xf32>
    %235 = math.exp %234 : vector<1x8x8xf32>
    %cst_68 = arith.constant dense<0.000000e+00> : vector<1x8xf32>
    %236 = vector.multi_reduction <add>, %235, %cst_68 [2] : vector<1x8x8xf32> to vector<1x8xf32>
    %237 = vector.shape_cast %236 : vector<1x8xf32> to vector<1x8x1xf32>
    %238 = tpu.reciprocal %237 {approx = true} : vector<1x8x1xf32> -> vector<1x8x1xf32>
    %239 = vector.broadcast %238 : vector<1x8x1xf32> to vector<1x8x8xf32>
    %240 = arith.mulf %235, %239 : vector<1x8x8xf32>
    %241 = arith.truncf %240 : vector<1x8x8xf32> to vector<1x8x8xbf16>
    "tpu.trace_start"() <{level = 10 : i32, message = "bts,bse->bte"}> : () -> ()
    %cst_69 = arith.constant dense<0.000000e+00> : vector<1x8x32xf32>
    %242 = tpu.matmul %241, %122, %cst_69 {dimension_numbers = #tpu.dot_dimension_numbers<[2], [1], [1], [2], [0, 0, 0, 1, 1, 2], [0], [0]>} : vector<1x8x8xbf16>, vector<1x8x32xbf16>, vector<1x8x32xf32> -> vector<1x8x32xf32>
    "tpu.trace_stop"() : () -> ()
    %c760_70 = arith.constant 760 : index
    %c0_71 = arith.constant 0 : index
    %243 = vector.load %arg3[%c760_70, %c0_71] : memref<1112x128xf32, #tpu.memory_space<vmem>>, vector<32x32xf32>
    %244 = vector.shape_cast %242 : vector<1x8x32xf32> to vector<8x32xf32>
    %245 = arith.truncf %244 : vector<8x32xf32> to vector<8x32xbf16>
    %246 = arith.truncf %243 : vector<32x32xf32> to vector<32x32xbf16>
    %cst_72 = arith.constant dense<0.000000e+00> : vector<8x32xf32>
    %247 = tpu.matmul %245, %246, %cst_72 {dimension_numbers = #tpu.dot_dimension_numbers<[1], [0], [0], [1], [0, 0, 1, 1], [], []>} : vector<8x32xbf16>, vector<32x32xbf16>, vector<8x32xf32> -> vector<8x32xf32>
    %248 = vector.shape_cast %247 : vector<8x32xf32> to vector<1x8x32xf32>
    %c792_73 = arith.constant 792 : index
    %c0_74 = arith.constant 0 : index
    %249 = vector.load %arg3[%c792_73, %c0_74] : memref<1112x128xf32, #tpu.memory_space<vmem>>, vector<1x32xf32>
    %250 = vector.shape_cast %249 : vector<1x32xf32> to vector<1x1x32xf32>
    %251 = vector.broadcast %250 : vector<1x1x32xf32> to vector<1x8x32xf32>
    %252 = arith.addf %248, %251 : vector<1x8x32xf32>
    %253 = arith.addf %215, %252 : vector<1x8x32xf32>
    %cst_75 = arith.constant 0.707106769 : f32
    %254 = vector.broadcast %cst_75 : f32 to vector<1x8x32xf32>
    %255 = arith.mulf %253, %254 : vector<1x8x32xf32>
    %256 = arith.addf %255, %190 : vector<1x8x32xf32>
    %cst_76 = arith.constant 0.707106769 : f32
    %257 = vector.broadcast %cst_76 : f32 to vector<1x8x32xf32>
    %258 = arith.mulf %256, %257 : vector<1x8x32xf32>
    %c680 = arith.constant 680 : index
    %c0_77 = arith.constant 0 : index
    %259 = vector.load %arg3[%c680, %c0_77] : memref<1112x128xf32, #tpu.memory_space<vmem>>, vector<32x32xf32>
    %260 = vector.shape_cast %258 : vector<1x8x32xf32> to vector<8x32xf32>
    %261 = arith.truncf %260 : vector<8x32xf32> to vector<8x32xbf16>
    %262 = arith.truncf %259 : vector<32x32xf32> to vector<32x32xbf16>
    %cst_78 = arith.constant dense<0.000000e+00> : vector<8x32xf32>
    %263 = tpu.matmul %261, %262, %cst_78 {dimension_numbers = #tpu.dot_dimension_numbers<[1], [0], [0], [1], [0, 0, 1, 1], [], []>} : vector<8x32xbf16>, vector<32x32xbf16>, vector<8x32xf32> -> vector<8x32xf32>
    %264 = vector.shape_cast %263 : vector<8x32xf32> to vector<1x8x32xf32>
    %c712 = arith.constant 712 : index
    %c0_79 = arith.constant 0 : index
    %265 = vector.load %arg3[%c712, %c0_79] : memref<1112x128xf32, #tpu.memory_space<vmem>>, vector<1x32xf32>
    %266 = vector.shape_cast %265 : vector<1x32xf32> to vector<1x1x32xf32>
    %267 = vector.broadcast %266 : vector<1x1x32xf32> to vector<1x8x32xf32>
    %268 = arith.addf %264, %267 : vector<1x8x32xf32>
    %c1072 = arith.constant 1072 : index
    %c0_80 = arith.constant 0 : index
    %269 = vector.load %arg3[%c1072, %c0_80] : memref<1112x128xf32, #tpu.memory_space<vmem>>, vector<32x128xf32>
    %270 = vector.shape_cast %268 : vector<1x8x32xf32> to vector<8x32xf32>
    %271 = arith.truncf %270 : vector<8x32xf32> to vector<8x32xbf16>
    %272 = arith.truncf %269 : vector<32x128xf32> to vector<32x128xbf16>
    %cst_81 = arith.constant dense<0.000000e+00> : vector<8x128xf32>
    %273 = tpu.matmul %271, %272, %cst_81 {dimension_numbers = #tpu.dot_dimension_numbers<[1], [0], [0], [1], [0, 0, 1, 1], [], []>} : vector<8x32xbf16>, vector<32x128xbf16>, vector<8x128xf32> -> vector<8x128xf32>
    %274 = vector.shape_cast %273 : vector<8x128xf32> to vector<1x8x128xf32>
    %c1104 = arith.constant 1104 : index
    %c0_82 = arith.constant 0 : index
    %275 = vector.load %arg3[%c1104, %c0_82] : memref<1112x128xf32, #tpu.memory_space<vmem>>, vector<1x128xf32>
    %276 = vector.shape_cast %275 : vector<1x128xf32> to vector<1x1x128xf32>
    %277 = vector.broadcast %276 : vector<1x1x128xf32> to vector<1x8x128xf32>
    %278 = arith.addf %274, %277 : vector<1x8x128xf32>
    %c0_83 = arith.constant 0 : index
    %c0_84 = arith.constant 0 : index
    %c0_85 = arith.constant 0 : index
    %279 = vector.load %arg4[%c0_83, %c0_84, %c0_85] : memref<1x8x128xf32, #tpu.memory_space<vmem>>, vector<1x8x128xf32>
    tpu.vector_store %arg4[%c0_83, %c0_84, %c0_85], %278 {strides = array<i32>} : memref<1x8x128xf32, #tpu.memory_space<vmem>>, vector<1x8x128xf32>,
    %cst_86 = arith.constant 0.000000e+00 : f32
    %280 = vector.broadcast %cst_86 : f32 to vector<1x8x120xf32>
    %281 = tpu.concatenate %240, %280 in 2 : vector<1x8x8xf32>, vector<1x8x120xf32> -> vector<1x8x128xf32>
    %c0_87 = arith.constant 0 : index
    %c0_88 = arith.constant 0 : index
    %c0_89 = arith.constant 0 : index
    %282 = vector.load %arg5[%c0_87, %c0_88, %c0_89] : memref<1x8x128xf32, #tpu.memory_space<vmem>>, vector<1x8x128xf32>
    tpu.vector_store %arg5[%c0_87, %c0_88, %c0_89], %281 {strides = array<i32>} : memref<1x8x128xf32, #tpu.memory_space<vmem>>, vector<1x8x128xf32>,
    return
  }
  func.func @transform_0(%arg0: i32) -> (i32, i32, i32) {
    %c0_i32 = arith.constant 0 : i32
    %c0_i32_0 = arith.constant 0 : i32
    %c0_i32_1 = arith.constant 0 : i32
    return %arg0, %c0_i32, %c0_i32_0 : i32, i32, i32
  }
  func.func @transform_1(%arg0: i32) -> (i32, i32, i32) {
    %c0_i32 = arith.constant 0 : i32
    %c0_i32_0 = arith.constant 0 : i32
    %c0_i32_1 = arith.constant 0 : i32
    return %arg0, %c0_i32, %c0_i32_0 : i32, i32, i32
  }
  func.func @transform_2(%arg0: i32) -> (i32, i32) {
    %c0_i32 = arith.constant 0 : i32
    %c0_i32_0 = arith.constant 0 : i32
    %c0_i32_1 = arith.constant 0 : i32
    return %c0_i32, %c0_i32_0 : i32, i32
  }
  func.func @transform_3(%arg0: i32) -> (i32, i32, i32) {
    %c0_i32 = arith.constant 0 : i32
    %c0_i32_0 = arith.constant 0 : i32
    %c0_i32_1 = arith.constant 0 : i32
    return %arg0, %c0_i32, %c0_i32_0 : i32, i32, i32
  }
  func.func @transform_4(%arg0: i32) -> (i32, i32, i32) {
    %c0_i32 = arith.constant 0 : i32
    %c0_i32_0 = arith.constant 0 : i32
    %c0_i32_1 = arith.constant 0 : i32
    return %arg0, %c0_i32, %c0_i32_0 : i32, i32, i32
  }
}

</mosaic_0001>

<bundles_post_ra>
// kernel: seq2seq_cnn_forward.1
= control target key start
LH: loop header
LB: loop body
LE: loop exit
PB: predicated region body
PF: predicated region fallthrough
CT: control target
= control target key end

     0   :  { %10 = vsyncpa [#allocation3], 0  ;;  %s2710_s0 = inlined_call_operand.vmem [shape: s32[2,8,1], index: 0, kind: input, shape index: {}]   ;;  %s2711_s1 = inlined_call_operand.vmem [shape: s32[2,8,1], index: 1, kind: input, shape index: {}]   ;;  %s2712_s2 = inlined_call_operand.hbm [shape: f32[1112,128], index: 2, kind: input, shape index: {}]   ;;  %s2713_s3 = inlined_call_operand.hbm [shape: f32[2,8,128], index: 3, kind: output, shape index: {0}]   ;;  %s2714_s4 = inlined_call_operand.hbm [shape: f32[2,8,128], index: 4, kind: output, shape index: {1}]  }
   0x1   :  { %11 = vsyncpa [#allocation4], 0 }
   0x2   :  { %13 = vsyncpa [#allocation4 + $0x1], 0 }
   0x3   :  { %14 = vsyncpa [#allocation7], 0 }
   0x4   :  { %16 = vsyncpa [#allocation7 + $0x1], 0  ;;  %s2304_s15 = smov 0   ;;  %s2306_s16 = smov 0  }
   0x5   :  { %s2308_s17 = smov 0   ;;  %s2310_s18 = smov 0  }
   0x6 LB: > { %s2325_s19 = sadd.s32 4294967295, %s2265_s18   ;;  %s1686_s20 = sadd.s32 4294967294, %s2265_s18   ;;  %s2265_s18 = sphi %s2310_s18, %s2724_s18   ;;  %s2261_s17 = sphi %s2308_s17, %s2723_s17   ;;  %s2257_s16 = sphi %s2306_s16, %s2722_s16   ;;  %s2253_s15 = sphi %s2304_s15, %s2721_s15  }
   0x7   : > { %s2329_s21 = sadd.s32 1, %s2265_s18   ;;  %s102_s22 = sadd.s32 1, %s2261_s17 }
   0x8   : > { %s99_s23 = ssub.s32 %s2265_s18, %s2329_s21  ;;  %p112_p0 = scmp.ne.s32.totalorder %s2261_s17, %s2257_s16 }
   0x9   : > { %p100_p1 = scmp.eq.s32.totalorder %s99_s23, 0  ;;  %p113_p2 = scmp.eq.s32.totalorder %s2325_s19, 1 }
   0xa   : > { %p118_p3 = scmp.ne.s32.totalorder %s2257_s16, %s2253_s15  ;;  %p119_p4 = scmp.eq.s32.totalorder %s1686_s20, 1 }
   0xb   : > { %s2340_s24 = scalar_select %p100_p1, %s2261_s17, %s102_s22  }
   0xc   : > { %p2342_p5 = por %p113_p2, %p112_p0  ;;  %p2346_p6 = por %p119_p4, %p118_p3 }
   0xd   : > { %p1687_p7 = scmp.ge.s32.totalorder %s2265_s18, 1  ;;  %p152_p8 = scmp.lt.s32.totalorder %s2265_s18, 3 }
   0xe   : > { %s2716_s26 = scalar_select %p2346_p6, 1, 0 }
   0xf   : > { %p2074_p9 = scmp.eq.s32.totalorder %s2325_s19, 0  ;;  %p2353_p10 = pnand %p1687_p7, %p152_p8 }
  0x10   : > { %s2267_s28 = smov [#allocation2]  }
  0x11   : > { %s164_s29 = sshll.u32 %s2267_s28, 4  ;;  %p2063_p11 = pneg %p2353_p10  ;;  %s165_s29 = int_to_ptr.vmem [resolvable:$true] %s164_s29 }
  0x12   : > { %s2156_s30 = scalar_lea.vmem %s165_s29, 17792  ;;  %p2164_p3 = scmp.lt.s32.totalorder %s165_s29, %s165_s29 }
  0x13   : > { %p2064_p12 = pnand %p2074_p9, %p2063_p11  ;;  %p2157_p0 = scmp.ne.s32.totalorder %s165_s29, %s2156_s30 }
  0x14   : > { %p2165_p4 = scmp.lt.s32.totalorder %s2156_s30, %s2156_s30 }
  0x15   : > { %p2147_p13 = pneg %p2064_p12 }
  0x16   : > { %p2166_p6 = por %p2165_p4, %p2164_p3 }
  0x17   : > { %p2159_p1 = pnand %p2157_p0, %p2147_p13 }
  0x19   : > { %p2160_p2 = pneg %p2159_p1 }
  0x1b   : > { %p2167_p7 = pnand %p2166_p6, %p2160_p2 }
  0x1d   : > { %2170 = shalt.err (!%p2167_p7)
}
  0x1e   : > { %s2268_s5 = smov 128   ;;  %s2269_s6 = smov 8  }
  0x1f   : > { %2066 = dma.hbm_to_vmem [thread:$0]  (!%p2064_p12), %s2712_s2, 17792, %s165_s29, [#allocation3], %s2268_s5, %s2268_s5, %s2269_s6  }
  0x20   : > { %194 = sbr.rel (%p2353_p10) target bundleno = 5497 (0x1579), region = 32 }
  0x25   : > { %2240 = dma.done.wait (%p2074_p9), [#allocation3], 17792  }
  0x26   : > { %2242 = vsyncadd (%p2074_p9), [#allocation3], 4294949504  ;;  %p228_p8 = scmp.lt.s32.totalorder %s2325_s19, 1  ;;  %v2270_v0 = vmov 0   ;;  %v2271_v1 = vmov 0.0   ;;  %vm2272_vm0 = vmmov 0   ;;  %v255_v30 = vlaneseq }
  0x27   : > { %2119 = vset.pattern.permute.xlu0 %v2270_v0  ;;  %1839 = vmatprep.subr.bf16.mxu0 %v2271_v1  ;;  %v252_v3 = vld [vmem:[#allocation2 + $0x70] sm:$0xff]  ;;  %v253_v4 = vld [vmem:[#allocation2 + $0x78] sm:$0xff]  ;;  %v250_v6 = vld [vmem:[#allocation2 + $0x60] sm:$0xff]  ;;  %v2273_v33 = vmov 1.0|1.0   ;;  %vm320_vm3 = vcmask 261120  }
  0x28   : > { %s2373_s9 = scalar_select %p228_p8, %s2325_s19, 1  ;;  %1859 = vmatprep.subr.bf16.mxu1 %v2271_v1  ;;  %2120 = vset.pattern.permute.xlu1 %v2270_v0  ;;  %v271_v5 = vpack.c.bf16 %v253_v4, %v252_v3  ;;  %v251_v7 = vld [vmem:[#allocation2 + $0x68] sm:$0xff]  ;;  %v248_v9 = vld [vmem:[#allocation2 + $0x50] sm:$0xff]  ;;  %v249_v10 = vld [vmem:[#allocation2 + $0x58] sm:$0xff]  ;;  %v2395_v31 = vand.u32 127, %v255_v30  ;;  %vm390_vm4 = vcmask 1040384  }
  0x29   : > { %1855 = vmatprep.mubr.msk.bf16.mxu0 %vm2272_vm0, %v2271_v1  ;;  %1863 = vmatprep.mubr.msk.bf16.mxu1 %vm2272_vm0, %v2271_v1  ;;  %v270_v8 = vpack.c.bf16 %v251_v7, %v250_v6  ;;  %v315_v11 = vld [vmem:[#allocation2 + $0xa0] sm:$0xff]  ;;  %v316_v12 = vld [vmem:[#allocation2 + $0xa8] sm:$0xff]  ;;  %v269_v13 = vpack.c.bf16 %v249_v10, %v248_v9  ;;  %v244_v18 = vld [vmem:[#allocation2 + $0x30] sm:$0xff]  ;;  %vm402_vm5 = vcmask 1045504   ;;  %vm395_vm6 = vcmask 1046528   ;;  %s2274_s14 = smov 64  }
  0x2a   : > { %s1694_s10 = sshll.u32 %s2373_s9, 3  ;;  %1840 = vmatpush3.bf16.msra.mxu0 %v271_v5  ;;  %v319_v14 = vpack.c.bf16 %v316_v12, %v315_v11  ;;  %v246_v15 = vld [vmem:[#allocation2 + $0x40] sm:$0xff]  ;;  %v247_v16 = vld [vmem:[#allocation2 + $0x48] sm:$0xff]  ;;  %v245_v19 = vld [vmem:[#allocation2 + $0x38] sm:$0xff]  ;;  %s2275_s20 = smov 32   ;;  %vm410_vm7 = vcmask 523264  }
  0x2b   : > { %s231_s13 = scalar_lea.vmem %s2710_s0, %s1694_s10  ;;  %1841 = vmatprep.subr.bf16.mxu0 %v2271_v1  ;;  %v268_v17 = vpack.c.bf16 %v247_v16, %v246_v15  ;;  %v267_v20 = vpack.c.bf16 %v245_v19, %v244_v18  ;;  %v242_v21 = vld [vmem:[#allocation2 + $0x20] sm:$0xff]  ;;  %v243_v22 = vld [vmem:[#allocation2 + $0x28] sm:$0xff]  ;;  %v240_v24 = vld [vmem:[#allocation2 + $0x10] sm:$0xff]  ;;  %vm412_vm8 = vcmask 785408   ;;  %s2276_s22 = smov 96   ;;  %vm797_vm12 = vcmask 1041408  }
  0x2c   : > { %v237_v2 = vld [vmem:[%s231_s13] sm:$0xff]  ;;  %1860 = vmatpush3.bf16.msra.mxu1 %v319_v14  ;;  %v266_v23 = vpack.c.bf16 %v243_v22, %v242_v21  ;;  %v241_v25 = vld [vmem:[#allocation2 + $0x18] sm:$0xff]  ;;  %v239_v28 = vld [vmem:[#allocation2 + $0x8] sm:$0xff]  ;;  %s235_s28 = scalar_lea.vmem %s2711_s1, %s1694_s10  ;;  %vm1001_vm13 = vcmask 1043456   ;;  %vm985_vm14 = vcmask 64512   ;;  %s2615_s29 = sand.u32 1, %s2257_s16  }
  0x2d   : > { %258 = vperm.xlu0 %2119, %v237_v2   ;;  %1861 = vmatprep.subr.bf16.mxu1 %v2271_v1  ;;  %v265_v26 = vpack.c.bf16 %v241_v25, %v240_v24  ;;  %v238_v27 = vld [vmem:[#allocation2] sm:$0xff]  ;;  %v313_v34 = vld [vmem:[#allocation2 + $0x90] sm:$0xff]  ;;  %v314_v35 = vld [vmem:[#allocation2 + $0x98] sm:$0xff]  ;;  %s1692_s30 = sshll.u32 %s2615_s29, 3  ;;  %s1746_s6 = sshll.u32 %s2325_s19, 7 }
  0x2e   : > { %1842 = vmatpush3.bf16.msra.mxu0 %v270_v8  ;;  %v264_v29 = vpack.c.bf16 %v239_v28, %v238_v27  ;;  %v318_v36 = vpack.c.bf16 %v314_v35, %v313_v34  ;;  %v254_v37 = vld [vmem:[#allocation2 + $0x80] sm:$0xff]  ;;  %v384_v44 = vld [vmem:[#allocation2 + $0x150] sm:$0xff]  ;;  %v385_v45 = vld [vmem:[#allocation2 + $0x158] sm:$0xff]  ;;  %s2621_s5 = scalar_lea.vmem [#allocation6], %s1692_s30  ;;  %s1569_s9 = scalar_lea.hbm %s2714_s4, %s1746_s6 }
  0x2f   : > { %1843 = vmatprep.subr.bf16.mxu0 %v2271_v1  ;;  %v382_v46 = vld [vmem:[#allocation2 + $0x140] sm:$0xff]  ;;  %v422_v47 = vpack.c.bf16 %v385_v45, %v384_v44  ;;  %v383_v48 = vld [vmem:[#allocation2 + $0x148] sm:$0xff]  ;;  %v380_v50 = vld [vmem:[#allocation2 + $0x130] sm:$0xff]  ;;  %s1571_s10 = sshll.u32 %s2621_s5, 4  ;;  %s1545_s11 = scalar_lea.sflag [#allocation7], %s2615_s29  ;;  %s1572_s10 = int_to_ptr.vmem [resolvable:$true] %s1571_s10 }
  0x30   : > { %1862 = vmatpush3.bf16.msra.mxu1 %v318_v36  ;;  %v421_v49 = vpack.c.bf16 %v383_v48, %v382_v46  ;;  %v381_v51 = vld [vmem:[#allocation2 + $0x138] sm:$0xff]  ;;  %v378_v53 = vld [vmem:[#allocation2 + $0x120] sm:$0xff]  ;;  %v379_v54 = vld [vmem:[#allocation2 + $0x128] sm:$0xff]  ;;  %s2171_s12 = scalar_lea.vmem %s1572_s10, 128  ;;  %s2277_s13 = smov [#allocation6]  }
  0x31   : > { %1867 = vmatprep.subr.bf16.mxu1 %v2271_v1  ;;  %v420_v52 = vpack.c.bf16 %v381_v51, %v380_v50  ;;  %v419_v55 = vpack.c.bf16 %v379_v54, %v378_v53  ;;  %v376_v56 = vld [vmem:[#allocation2 + $0x110] sm:$0xff]  ;;  %v377_v57 = vld [vmem:[#allocation2 + $0x118] sm:$0xff]  ;;  %v374_v59 = vld [vmem:[#allocation2 + $0x100] sm:$0xff]  ;;  %p2172_p6 = scmp.ne.s32.totalorder %s1572_s10, %s2171_s12 }
  0x32   : > { %1844 = vmatpush3.bf16.msra.mxu0 %v269_v13  ;;  %v418_v58 = vpack.c.bf16 %v377_v57, %v376_v56  ;;  %v375_v60 = vld [vmem:[#allocation2 + $0x108] sm:$0xff]  ;;  %v372_v62 = vld [vmem:[#allocation2 + $0xf0] sm:$0xff]  ;;  %v373_v63 = vld [vmem:[#allocation2 + $0xf8] sm:$0xff] }
  0x33   : > { %1845 = vmatprep.subr.bf16.mxu0 %v2271_v1  ;;  %v417_v61 = vpack.c.bf16 %v375_v60, %v374_v59  ;;  %v416_v0 = vpack.c.bf16 %v373_v63, %v372_v62  ;;  %v370_v2 = vld [vmem:[#allocation2 + $0xe0] sm:$0xff]  ;;  %v371_v3 = vld [vmem:[#allocation2 + $0xe8] sm:$0xff]  ;;  %v1700_v5 = vld [vmem:[#allocation2 + $0xb0] ss:$0 sm:$0xff]  ;;  %p2173_p9 = pnand %p2172_p6, %p2342_p5 }
  0x34   : > { %v415_v4 = vpack.c.bf16 %v371_v3, %v370_v2  ;;  %vm2428_vm9 = vmpackc.low %vm412_vm8, %vm412_vm8  ;;  %v491_v45 = vld [vmem:[#allocation2 + $0x1b8] sm:$0xff]  ;;  %v492_v46 = vld [vmem:[#allocation2 + $0x1c0] sm:$0xff] }
  0x35   : > { %v489_v48 = vld [vmem:[#allocation2 + $0x1a8] sm:$0xff]  ;;  %v487_v51 = vld [vmem:[#allocation2 + $0x198] sm:$0xff]  ;;  %p2174_p10 = pneg %p2173_p9 }
  0x36   : > { %1846 = vmatpush3.bf16.msra.mxu0 %v268_v17  ;;  %v485_v54 = vld [vmem:[#allocation2 + $0x188] sm:$0xff]  ;;  %v483_v57 = vld [vmem:[#allocation2 + $0x178] sm:$0xff] }
  0x37   : > { %1847 = vmatprep.subr.bf16.mxu0 %v2271_v1  ;;  %v481_v60 = vld [vmem:[#allocation2 + $0x168] sm:$0xff] }
  0x3a   : > { %1848 = vmatpush3.bf16.msra.mxu0 %v267_v20 }
  0x3b   : > { %1849 = vmatprep.subr.bf16.mxu0 %v2271_v1 }
  0x3e   : > { %1850 = vmatpush3.bf16.msra.mxu0 %v266_v23 }
  0x3f   : > { %1851 = vmatprep.subr.bf16.mxu0 %v2271_v1 }
  0x42   : > { %1852 = vmatpush3.bf16.msra.mxu0 %v265_v26  ;;  %v1704_v26 = vld [vmem:[#allocation2 + $0x160] ss:$0 sm:$0xff] }
  0x43   : > { %1853 = vmatprep.subr.bf16.mxu0 %v2271_v1 }
  0x46   : > { %1854 = vmatpush3.bf16.msra.mxu0 %v264_v29 }
  0x47   : > { %1887 = vmatprep.subr.bf16.mxu0 %v2271_v1 }
  0xa8   : > { %v259_v32 = vpop.permute.xlu0 %258 }
  0xa9   : > { %vm260_vm1 = vcmp.eq.s32.totalorder %v2395_v31, %v259_v32 }
  0xaa   : > { %vm1697_vm2 = vmpackc.low %vm260_vm1, %vm260_vm1 }
  0xab   : > { %1856 = vmatmul.mubr.msk.bf16.vlgmr.msra.gmra.mxu0 %vm1697_vm2, %v2273_v33 }
  0xac   : > { %1903 = vmatprep.mubr.msk.bf16.mxu0 %vm2272_vm0, %v2271_v1 }
 0x16b   : > { %v306_v38 = vpop.f32.mrf.mxu0 }
 0x16c   : > { %v2402_v39 = vadd.f32 %v306_v38, %v254_v37  ;;  %v495_v38 = vld [vmem:[#allocation2 + $0x1d8] sm:$0xff] }
 0x16d   : > { %v1857_v40 = vpop.f32.mrf.mxu0 }
 0x16e   : > { %v317_v41 = vpack.c.bf16 %v2402_v39, %v2402_v39  ;;  %v496_v40 = vld [vmem:[#allocation2 + $0x1e0] sm:$0xff] }
 0x16f   : > { %v309_v42 = vpop.f32.mrf.mxu0 }
 0x170   : > { %1864 = vmatmul.mubr.msk.bf16.vlgmr.msra.gmra.mxu1 %vm320_vm3, %v317_v41  ;;  %v493_v41 = vld [vmem:[#allocation2 + $0x1c8] sm:$0xff]  ;;  %v528_v42 = vpack.c.bf16 %v496_v40, %v495_v38 }
 0x171   : > { %v1858_v43 = vpop.f32.mrf.mxu0  ;;  %1883 = vmatprep.mubr.msk.bf16.mxu1 %vm2272_vm0, %v2271_v1  ;;  %1868 = vmatpush3.bf16.msra.mxu1 %v422_v47  ;;  %v526_v47 = vpack.c.bf16 %v492_v46, %v491_v45 }
 0x172   : > { %1869 = vmatprep.subr.bf16.mxu1 %v2271_v1  ;;  %v494_v43 = vld [vmem:[#allocation2 + $0x1d0] sm:$0xff]  ;;  %1888 = vmatpush3.bf16.msra.mxu0 %v528_v42  ;;  %v660_v42 = vld [vmem:[#allocation2 + $0x260] sm:$0xff] }
 0x173   : > { %v527_v44 = vpack.c.bf16 %v494_v43, %v493_v41  ;;  %1889 = vmatprep.subr.bf16.mxu0 %v2271_v1  ;;  %v661_v43 = vld [vmem:[#allocation2 + $0x268] sm:$0xff] }
 0x174   : > { %v677_v45 = vpack.c.bf16 %v661_v43, %v660_v42  ;;  %v779_v43 = vld [vmem:[#allocation2 + $0x330] sm:$0xff] }
 0x175   : > { %1870 = vmatpush3.bf16.msra.mxu1 %v421_v49  ;;  %v490_v49 = vld [vmem:[#allocation2 + $0x1b0] sm:$0xff] }
 0x176   : > { %1871 = vmatprep.subr.bf16.mxu1 %v2271_v1  ;;  %1890 = vmatpush3.bf16.msra.mxu0 %v527_v44  ;;  %v525_v50 = vpack.c.bf16 %v490_v49, %v489_v48  ;;  %v659_v48 = vld [vmem:[#allocation2 + $0x258] sm:$0xff] }
 0x177   : > { %1891 = vmatprep.subr.bf16.mxu0 %v2271_v1 }
 0x179   : > { %1872 = vmatpush3.bf16.msra.mxu1 %v420_v52  ;;  %v488_v52 = vld [vmem:[#allocation2 + $0x1a0] sm:$0xff] }
 0x17a   : > { %1873 = vmatprep.subr.bf16.mxu1 %v2271_v1  ;;  %1892 = vmatpush3.bf16.msra.mxu0 %v526_v47  ;;  %v524_v53 = vpack.c.bf16 %v488_v52, %v487_v51  ;;  %v658_v47 = vld [vmem:[#allocation2 + $0x250] sm:$0xff]  ;;  %v657_v51 = vld [vmem:[#allocation2 + $0x248] sm:$0xff] }
 0x17b   : > { %1893 = vmatprep.subr.bf16.mxu0 %v2271_v1  ;;  %v676_v49 = vpack.c.bf16 %v659_v48, %v658_v47  ;;  %v778_v47 = vld [vmem:[#allocation2 + $0x328] sm:$0xff] }
 0x17d   : > { %1874 = vmatpush3.bf16.msra.mxu1 %v419_v55  ;;  %v486_v55 = vld [vmem:[#allocation2 + $0x190] sm:$0xff] }
 0x17e   : > { %1875 = vmatprep.subr.bf16.mxu1 %v2271_v1  ;;  %1894 = vmatpush3.bf16.msra.mxu0 %v525_v50  ;;  %v523_v56 = vpack.c.bf16 %v486_v55, %v485_v54  ;;  %v656_v50 = vld [vmem:[#allocation2 + $0x240] sm:$0xff]  ;;  %v655_v54 = vld [vmem:[#allocation2 + $0x238] sm:$0xff] }
 0x17f   : > { %1895 = vmatprep.subr.bf16.mxu0 %v2271_v1  ;;  %v675_v52 = vpack.c.bf16 %v657_v51, %v656_v50 }
 0x181   : > { %1876 = vmatpush3.bf16.msra.mxu1 %v418_v58  ;;  %v484_v58 = vld [vmem:[#allocation2 + $0x180] sm:$0xff] }
 0x182   : > { %1877 = vmatprep.subr.bf16.mxu1 %v2271_v1  ;;  %1896 = vmatpush3.bf16.msra.mxu0 %v524_v53  ;;  %v522_v59 = vpack.c.bf16 %v484_v58, %v483_v57  ;;  %v654_v53 = vld [vmem:[#allocation2 + $0x230] sm:$0xff]  ;;  %v653_v57 = vld [vmem:[#allocation2 + $0x228] sm:$0xff] }
 0x183   : > { %1897 = vmatprep.subr.bf16.mxu0 %v2271_v1  ;;  %v674_v55 = vpack.c.bf16 %v655_v54, %v654_v53 }
 0x185   : > { %1878 = vmatpush3.bf16.msra.mxu1 %v417_v61  ;;  %v482_v61 = vld [vmem:[#allocation2 + $0x170] sm:$0xff] }
 0x186   : > { %1879 = vmatprep.subr.bf16.mxu1 %v2271_v1  ;;  %1898 = vmatpush3.bf16.msra.mxu0 %v523_v56  ;;  %v521_v62 = vpack.c.bf16 %v482_v61, %v481_v60  ;;  %v652_v56 = vld [vmem:[#allocation2 + $0x220] sm:$0xff]  ;;  %v651_v60 = vld [vmem:[#allocation2 + $0x218] sm:$0xff] }
 0x187   : > { %1899 = vmatprep.subr.bf16.mxu0 %v2271_v1  ;;  %v673_v58 = vpack.c.bf16 %v653_v57, %v652_v56 }
 0x189   : > { %1880 = vmatpush3.bf16.msra.mxu1 %v416_v0 }
 0x18a   : > { %1881 = vmatprep.subr.bf16.mxu1 %v2271_v1  ;;  %1900 = vmatpush3.bf16.msra.mxu0 %v522_v59  ;;  %v650_v59 = vld [vmem:[#allocation2 + $0x210] sm:$0xff] }
 0x18b   : > { %1901 = vmatprep.subr.bf16.mxu0 %v2271_v1  ;;  %v672_v61 = vpack.c.bf16 %v651_v60, %v650_v59 }
 0x18d   : > { %1882 = vmatpush3.bf16.msra.mxu1 %v415_v4 }
 0x18e   : > { %1907 = vmatprep.subr.bf16.mxu1 %v2271_v1  ;;  %1902 = vmatpush3.bf16.msra.mxu0 %v521_v62  ;;  %v648_v62 = vld [vmem:[#allocation2 + $0x200] sm:$0xff] }
 0x18f   : > { %1935 = vmatprep.subr.bf16.mxu0 %v2271_v1 }
 0x230   : > { %v358_v6 = vpop.f32.mrf.mxu1 }
 0x231   : > { %v2417_v7 = vadd.f32 %v1700_v5, %v358_v6 }
 0x232   : > { %v1865_v8 = vpop.f32.mrf.mxu1 }
 0x233   : > { %v388_v9 = vrot.slane %v2417_v7, 7 }
 0x234   : > { %v361_v10 = vpop.f32.mrf.mxu1 }
 0x235   : > { %v391_v11 = vsel %vm390_vm4, 0.0, %v388_v9  ;;  %v392_v12 = vsel %vm390_vm4, %v388_v9, 0.0 }
 0x236   : > { %v397_v13 = vrot.slane %v392_v12, 1  ;;  %v1866_v14 = vpop.f32.mrf.mxu1  ;;  %v403_v15 = vrot.slane %v391_v11, 2  ;;  %v404_v16 = vrot.slane %v392_v12, 2  ;;  %v396_v17 = vrot.slane %v391_v11, 1 }
 0x238   : > { %v405_v18 = vsel %vm402_vm5, %v403_v15, %v404_v16  ;;  %v398_v19 = vsel %vm395_vm6, %v396_v17, %v397_v13 }
 0x239   : > { %406 = vrot.lane.b32.xlu1 %v405_v18, %s2274_s14  ;;  %399 = vrot.lane.b32.xlu0 %v398_v19, %s2275_s20  ;;  %v645_v18 = vld [vmem:[%s235_s28] sm:$0xff]  ;;  %v1709_v19 = vld [vmem:[#allocation2 + $0x1e8] ss:$0 sm:$0xff] }
 0x2ab   : > { %v407_v20 = vpop.permute.xlu1 %406  ;;  %v400_v21 = vpop.permute.xlu0 %399 }
 0x2ac   : > { %v409_v22 = vsel %vm320_vm3, %v391_v11, %v400_v21 }
 0x2ad   : > { %v411_v23 = vsel %vm410_vm7, %v409_v22, %v407_v20 }
 0x2ae   : > { %v1702_v25 = vpack.c.bf16 %v411_v23, %v411_v23 }
 0x2b0   : > { %1884 = vmatmul.mubr.msk.bf16.vlgmr.msra.gmra.mxu1 %vm2428_vm9, %v1702_v25 }
 0x2b1   : > { %1911 = vmatprep.mubr.msk.bf16.mxu1 %vm2272_vm0, %v2271_v1 }
 0x370   : > { %v457_v27 = vpop.f32.mrf.mxu1 }
 0x371   : > { %v467_v28 = vadd.f32 %v1704_v26, %v457_v27 }
 0x372   : > { %v1885_v29 = vpop.f32.mrf.mxu1 }
 0x373   : > { %v1705_v30 = vmul.f32 -1.442695, %v467_v28  ;;  %v589_v29 = vld [vmem:[#allocation2 + $0xc8] sm:$0xff] }
 0x374   : > { %v460_v32 = vpop.f32.mrf.mxu1 }
 0x375   : > { %2121 = vpow2.f32 %v1705_v30  ;;  %v590_v30 = vld [vmem:[#allocation2 + $0xd0] sm:$0xff] }
 0x376   : > { %v1886_v34 = vpop.f32.mrf.mxu1  ;;  %v593_v32 = vpack.c.bf16 %v590_v30, %v589_v29  ;;  %v788_v29 = vld [vmem:[#allocation2 + $0x378] sm:$0xff] }
 0x377   : > { %v587_v34 = vld [vmem:[#allocation2 + $0xb8] sm:$0xff] }
 0x378   : > { %1908 = vmatpush3.bf16.msra.mxu1 %v593_v32  ;;  %v785_v32 = vld [vmem:[#allocation2 + $0x360] sm:$0xff] }
 0x379   : > { %1909 = vmatprep.subr.bf16.mxu1 %v2271_v1 }
 0x382   : > { %v2122_v35 = vpop.eup %2121 }
 0x383   : > { %v471_v36 = vadd.f32 1.0, %v2122_v35  ;;  %v588_v35 = vld [vmem:[#allocation2 + $0xc0] sm:$0xff] }
 0x385   : > { %2123 = vrcp.f32 %v471_v36  ;;  %v592_v36 = vpack.c.bf16 %v588_v35, %v587_v34  ;;  %v786_v34 = vld [vmem:[#allocation2 + $0x368] sm:$0xff] }
 0x386   : > { %v820_v35 = vpack.c.bf16 %v786_v34, %v785_v32 }
 0x387   : > { %1910 = vmatpush3.bf16.msra.mxu1 %v592_v36  ;;  %v783_v36 = vld [vmem:[#allocation2 + $0x350] sm:$0xff] }
 0x388   : > { %1915 = vmatprep.subr.bf16.mxu1 %v2271_v1 }
 0x392   : > { %v2124_v37 = vpop.eup %2123 }
 0x393   : > { %475 = vrot.lane.b32.xlu1 %v2124_v37, %s2276_s22 }
 0x405   : > { %v476_v63 = vpop.permute.xlu1 %475 }
 0x406   : > { %v478_v0 = vmul.f32 %v476_v63, %v467_v28  ;;  %v649_v63 = vld [vmem:[#allocation2 + $0x208] sm:$0xff] }
 0x408   : > { %v479_v2 = vadd.f32 %v478_v0, %v2417_v7  ;;  %v671_v0 = vpack.c.bf16 %v649_v63, %v648_v62 }
 0x40a   : > { %v480_v3 = vmul.f32 0.70710677, %v479_v2  ;;  %v646_v2 = vld [vmem:[#allocation2 + $0x1f0] sm:$0xff] }
 0x40c   : > { %v499_v4 = vrot.slane %v480_v3, 7 }
 0x40e   : > { %v501_v5 = vsel %vm390_vm4, 0.0, %v499_v4  ;;  %v502_v6 = vsel %vm390_vm4, %v499_v4, 0.0 }
 0x40f   : > { %v511_v8 = vrot.slane %v501_v5, 2  ;;  %v512_v9 = vrot.slane %v502_v6, 2  ;;  %v505_v10 = vrot.slane %v501_v5, 1  ;;  %v506_v11 = vrot.slane %v502_v6, 1  ;;  %v721_v6 = vld [vmem:[#allocation2 + $0x290] sm:$0xff] }
 0x411   : > { %v513_v12 = vsel %vm402_vm5, %v511_v8, %v512_v9  ;;  %v507_v13 = vsel %vm395_vm6, %v505_v10, %v506_v11  ;;  %v722_v8 = vld [vmem:[#allocation2 + $0x298] sm:$0xff]  ;;  %v719_v10 = vld [vmem:[#allocation2 + $0x280] sm:$0xff]  ;;  %v720_v11 = vld [vmem:[#allocation2 + $0x288] sm:$0xff] }
 0x412   : > { %514 = vrot.lane.b32.xlu1 %v513_v12, %s2274_s14  ;;  %508 = vrot.lane.b32.xlu0 %v507_v13, %s2275_s20  ;;  %v725_v9 = vpack.c.bf16 %v722_v8, %v721_v6  ;;  %v724_v12 = vpack.c.bf16 %v720_v11, %v719_v10  ;;  %v883_v6 = vld [vmem:[#allocation2 + $0x2e8] sm:$0xff] }
 0x416   : > { %664 = vperm.xlu1 %2120, %v645_v18  }
 0x484   : > { %v515_v7 = vpop.permute.xlu1 %514  ;;  %v509_v14 = vpop.permute.xlu0 %508 }
 0x485   : > { %v517_v15 = vsel %vm320_vm3, %v501_v5, %v509_v14  ;;  %v662_v14 = vld [vmem:[#allocation2 + $0x270] sm:$0xff] }
 0x486   : > { %v518_v16 = vsel %vm410_vm7, %v517_v15, %v515_v7 }
 0x487   : > { %v1707_v17 = vpack.c.bf16 %v518_v16, %v518_v16 }
 0x489   : > { %1904 = vmatmul.mubr.msk.bf16.vlgmr.msra.gmra.mxu0 %vm2428_vm9, %v1707_v17 }
 0x48a   : > { %1939 = vmatprep.mubr.msk.bf16.mxu0 %vm2272_vm0, %v2271_v1  ;;  %1936 = vmatpush3.bf16.msra.mxu0 %v725_v9  ;;  %v1721_v9 = vld [vmem:[#allocation2 + $0x3a0] ss:$0 sm:$0xff] }
 0x48b   : > { %1937 = vmatprep.subr.bf16.mxu0 %v2271_v1 }
 0x48e   : > { %1938 = vmatpush3.bf16.msra.mxu0 %v724_v12 }
 0x48f   : > { %1943 = vmatprep.subr.bf16.mxu0 %v2271_v1 }
 0x491   : > { %v665_v4 = vpop.permute.xlu1 %664 }
 0x492   : > { %vm666_vm10 = vcmp.eq.s32.totalorder %v2395_v31, %v665_v4 }
 0x493   : > { %vm1714_vm11 = vmpackc.low %vm666_vm10, %vm666_vm10 }
 0x549   : > { %v563_v20 = vpop.f32.mrf.mxu0 }
 0x54a   : > { %v573_v21 = vadd.f32 %v1709_v19, %v563_v20 }
 0x54b   : > { %v1905_v22 = vpop.f32.mrf.mxu0 }
 0x54c   : > { %v1710_v23 = vmul.f32 -1.442695, %v573_v21  ;;  %v792_v22 = vld [vmem:[#allocation2 + $0x398] sm:$0xff] }
 0x54d   : > { %v566_v25 = vpop.f32.mrf.mxu0 }
 0x54e   : > { %2125 = vpow2.f32 %v1710_v23  ;;  %v789_v23 = vld [vmem:[#allocation2 + $0x380] sm:$0xff] }
 0x54f   : > { %v1906_v26 = vpop.f32.mrf.mxu0 }
 0x550   : > { %v790_v26 = vld [vmem:[#allocation2 + $0x388] sm:$0xff] }
 0x55b   : > { %v2126_v27 = vpop.eup %2125 }
 0x55c   : > { %v577_v28 = vadd.f32 1.0, %v2126_v27  ;;  %v822_v27 = vpack.c.bf16 %v790_v26, %v789_v23 }
 0x55e   : > { %2127 = vrcp.f32 %v577_v28  ;;  %v787_v28 = vld [vmem:[#allocation2 + $0x370] sm:$0xff] }
 0x55f   : > { %v821_v30 = vpack.c.bf16 %v788_v29, %v787_v28  ;;  %v2537_v29 = vld [vmem:[#allocation2 + $0x2f0] ss:$0 sm:$0xff] }
 0x56b   : > { %v2128_v37 = vpop.eup %2127 }
 0x56c   : > { %581 = vrot.lane.b32.xlu0 %v2128_v37, %s2276_s22  ;;  %v784_v37 = vld [vmem:[#allocation2 + $0x358] sm:$0xff] }
 0x5de   : > { %v582_v38 = vpop.permute.xlu0 %581 }
 0x5df   : > { %v584_v40 = vmul.f32 %v582_v38, %v573_v21  ;;  %v791_v21 = vld [vmem:[#allocation2 + $0x390] sm:$0xff]  ;;  %v819_v38 = vpack.c.bf16 %v784_v37, %v783_v36 }
 0x5e0   : > { %v823_v25 = vpack.c.bf16 %v792_v22, %v791_v21  ;;  %v1712_v21 = vld [vmem:[#allocation2 + $0xd8] ss:$0 sm:$0xff] }
 0x5e1   : > { %v585_v41 = vadd.f32 %v584_v40, %v480_v3  ;;  %v647_v3 = vld [vmem:[#allocation2 + $0x1f8] sm:$0xff]  ;;  %v781_v40 = vld [vmem:[#allocation2 + $0x340] sm:$0xff] }
 0x5e2   : > { %v670_v5 = vpack.c.bf16 %v647_v3, %v646_v2 }
 0x5e3   : > { %v586_v44 = vmul.f32 0.70710677, %v585_v41  ;;  %v782_v41 = vld [vmem:[#allocation2 + $0x348] sm:$0xff] }
 0x5e4   : > { %v818_v42 = vpack.c.bf16 %v782_v41, %v781_v40 }
 0x5e5   : > { %v591_v46 = vpack.c.bf16 %v586_v44, %v586_v44  ;;  %v780_v44 = vld [vmem:[#allocation2 + $0x338] sm:$0xff] }
 0x5e7   : > { %1912 = vmatmul.mubr.msk.bf16.vlgmr.msra.gmra.mxu1 %vm320_vm3, %v591_v46  ;;  %v777_v46 = vld [vmem:[#allocation2 + $0x320] sm:$0xff] }
 0x5e8   : > { %1916 = vmatpush3.bf16.msra.mxu1 %v677_v45  ;;  %1931 = vmatprep.mubr.msk.bf16.mxu1 %vm2272_vm0, %v2271_v1  ;;  %v817_v45 = vpack.c.bf16 %v780_v44, %v779_v43  ;;  %v816_v48 = vpack.c.bf16 %v778_v47, %v777_v46 }
 0x5e9   : > { %1917 = vmatprep.subr.bf16.mxu1 %v2271_v1 }
 0x5ec   : > { %1918 = vmatpush3.bf16.msra.mxu1 %v676_v49  ;;  %v1717_v49 = vld [vmem:[#allocation2 + $0x2a0] ss:$0 sm:$0xff] }
 0x5ed   : > { %1919 = vmatprep.subr.bf16.mxu1 %v2271_v1 }
 0x5f0   : > { %1920 = vmatpush3.bf16.msra.mxu1 %v675_v52 }
 0x5f1   : > { %1921 = vmatprep.subr.bf16.mxu1 %v2271_v1 }
 0x5f4   : > { %1922 = vmatpush3.bf16.msra.mxu1 %v674_v55 }
 0x5f5   : > { %1923 = vmatprep.subr.bf16.mxu1 %v2271_v1 }
 0x5f8   : > { %1924 = vmatpush3.bf16.msra.mxu1 %v673_v58 }
 0x5f9   : > { %1925 = vmatprep.subr.bf16.mxu1 %v2271_v1 }
 0x5fc   : > { %1926 = vmatpush3.bf16.msra.mxu1 %v672_v61 }
 0x5fd   : > { %1927 = vmatprep.subr.bf16.mxu1 %v2271_v1 }
 0x600   : > { %1928 = vmatpush3.bf16.msra.mxu1 %v671_v0 }
 0x601   : > { %1929 = vmatprep.subr.bf16.mxu1 %v2271_v1 }
 0x604   : > { %1930 = vmatpush3.bf16.msra.mxu1 %v670_v5  ;;  %v882_v5 = vld [vmem:[#allocation2 + $0x2e0] sm:$0xff] }
 0x605   : > { %1963 = vmatprep.subr.bf16.mxu1 %v2271_v1  ;;  %v2514_v8 = vpack.c.bf16 %v883_v6, %v882_v5  ;;  %v1119_v6 = vld [vmem:[#allocation2 + $0x418] sm:$0xff] }
 0x607   : > { %1932 = vmatmul.mubr.msk.bf16.vlgmr.msra.gmra.mxu1 %vm1714_vm11, %v2273_v33 }
 0x608   : > { %1967 = vmatprep.mubr.msk.bf16.mxu1 %vm2272_vm0, %v2271_v1  ;;  %1964 = vmatpush3.bf16.msra.mxu1 %v2514_v8 }
 0x609   : > { %1965 = vmatprep.subr.bf16.mxu1 %v2271_v1 }
 0x6a7   : > { %v2483_v31 = vpop.f32.mrf.mxu1 }
 0x6a8   : > { %v642_v22 = vadd.f32 %v1712_v21, %v2483_v31  ;;  %v1109_v21 = vld [vmem:[#allocation2 + $0x3c8] sm:$0xff] }
 0x6a9   : > { %v1913_v13 = vpop.f32.mrf.mxu1 }
 0x6aa   : > { %v643_v31 = vadd.f32 %v642_v22, %v2402_v39 }
 0x6ab   : > { %v634_v7 = vpop.f32.mrf.mxu1 }
 0x6ac   : > { %v644_v32 = vmul.f32 0.70710677, %v643_v31 }
 0x6ad   : > { %v1914_v33 = vpop.f32.mrf.mxu1 }
 0x6c7   : > { %v712_v15 = vpop.f32.mrf.mxu1 }
 0x6c8   : > { %v2485_v16 = vadd.f32 %v712_v15, %v662_v14 }
 0x6c9   : > { %v1933_v17 = vpop.f32.mrf.mxu1 }
 0x6ca   : > { %v723_v18 = vpack.c.bf16 %v2485_v16, %v2485_v16  ;;  %v880_v17 = vld [vmem:[#allocation2 + $0x2d0] sm:$0xff] }
 0x6cb   : > { %v715_v19 = vpop.f32.mrf.mxu1 }
 0x6cc   : > { %1940 = vmatmul.mubr.msk.bf16.vlgmr.msra.gmra.mxu0 %vm320_vm3, %v723_v18  ;;  %v881_v18 = vld [vmem:[#allocation2 + $0x2d8] sm:$0xff] }
 0x6cd   : > { %v1934_v20 = vpop.f32.mrf.mxu1  ;;  %1959 = vmatprep.mubr.msk.bf16.mxu0 %vm2272_vm0, %v2271_v1  ;;  %1944 = vmatpush3.bf16.msra.mxu0 %v823_v25  ;;  %v2518_v19 = vpack.c.bf16 %v881_v18, %v880_v17  ;;  %v775_v25 = vpack.c.bf16 %v642_v22, %v642_v22  ;;  %v1111_v18 = vld [vmem:[#allocation2 + $0x3d8] sm:$0xff]  ;;  %v1110_v22 = vld [vmem:[#allocation2 + $0x3d0] sm:$0xff] }
 0x6ce   : > { %1945 = vmatprep.subr.bf16.mxu0 %v2271_v1 }
 0x6cf   : > { %1966 = vmatpush3.bf16.msra.mxu1 %v2518_v19  ;;  %v2530_v28 = vsel %vm320_vm3, %v775_v25, 0  ;;  %v1107_v25 = vld [vmem:[#allocation2 + $0x3b8] sm:$0xff] }
 0x6d0   : > { %1971 = vmatprep.subr.bf16.mxu1 %v2271_v1 }
 0x6d1   : > { %1946 = vmatpush3.bf16.msra.mxu0 %v822_v27 }
 0x6d2   : > { %1947 = vmatprep.subr.bf16.mxu0 %v2271_v1 }
 0x6d5   : > { %1948 = vmatpush3.bf16.msra.mxu0 %v821_v30 }
 0x6d6   : > { %1949 = vmatprep.subr.bf16.mxu0 %v2271_v1 }
 0x6d9   : > { %1950 = vmatpush3.bf16.msra.mxu0 %v820_v35 }
 0x6da   : > { %1951 = vmatprep.subr.bf16.mxu0 %v2271_v1 }
 0x6dd   : > { %1952 = vmatpush3.bf16.msra.mxu0 %v819_v38  ;;  %v776_v38 = vpack.c.bf16 %v644_v32, %v644_v32 }
 0x6de   : > { %1953 = vmatprep.subr.bf16.mxu0 %v2271_v1 }
 0x6df   : > { %v2542_v43 = vsel %vm1001_vm13, %v776_v38, 0  ;;  %v1106_v38 = vld [vmem:[#allocation2 + $0x3b0] sm:$0xff] }
 0x6e1   : > { %1954 = vmatpush3.bf16.msra.mxu0 %v818_v42 }
 0x6e2   : > { %1955 = vmatprep.subr.bf16.mxu0 %v2271_v1 }
 0x6e5   : > { %1956 = vmatpush3.bf16.msra.mxu0 %v817_v45 }
 0x6e6   : > { %1957 = vmatprep.subr.bf16.mxu0 %v2271_v1 }
 0x6e9   : > { %1958 = vmatpush3.bf16.msra.mxu0 %v816_v48 }
 0x6ea   : > { %1983 = vmatprep.subr.bf16.mxu0 %v2271_v1 }
 0x78c   : > { %v763_v50 = vpop.f32.mrf.mxu0 }
 0x78d   : > { %v2500_v51 = vadd.f32 %v1717_v49, %v763_v50 }
 0x78e   : > { %v1941_v52 = vpop.f32.mrf.mxu0 }
 0x78f   : > { %v795_v53 = vrot.slane %v2500_v51, 6 }
 0x790   : > { %v766_v54 = vpop.f32.mrf.mxu0 }
 0x791   : > { %v798_v55 = vsel %vm797_vm12, 1.0, %v795_v53  ;;  %v807_v56 = vrot.slane %v795_v53, 2  ;;  %v801_v57 = vrot.slane %v795_v53, 1  ;;  %v1047_v54 = vld [vmem:[#allocation2 + $0x308] sm:$0xff] }
 0x792   : > { %v1942_v58 = vpop.f32.mrf.mxu0  ;;  %v806_v59 = vrot.slane %v798_v55, 2  ;;  %v800_v60 = vrot.slane %v798_v55, 1 }
 0x793   : > { %v1046_v58 = vld [vmem:[#allocation2 + $0x300] sm:$0xff] }
 0x794   : > { %v808_v61 = vsel %vm402_vm5, %v806_v59, %v807_v56  ;;  %v802_v62 = vsel %vm395_vm6, %v800_v60, %v801_v57  ;;  %v1045_v56 = vld [vmem:[#allocation2 + $0x2f8] sm:$0xff] }
 0x795   : > { %809 = vrot.lane.b32.xlu1 %v808_v61, %s2274_s14  ;;  %803 = vrot.lane.b32.xlu0 %v802_v62, %s2275_s20  ;;  %v2553_v59 = vpack.c.bf16 %v1046_v58, %v1045_v56 }
 0x807   : > { %v810_v63 = vpop.permute.xlu1 %809  ;;  %v804_v0 = vpop.permute.xlu0 %803 }
 0x808   : > { %v812_v2 = vsel %vm320_vm3, %v798_v55, %v804_v0  ;;  %v1048_v55 = vld [vmem:[#allocation2 + $0x310] sm:$0xff] }
 0x809   : > { %v813_v3 = vsel %vm410_vm7, %v812_v2, %v810_v63  ;;  %v2550_v57 = vpack.c.bf16 %v1048_v55, %v1047_v54 }
 0x80a   : > { %v1719_v4 = vpack.c.bf16 %v813_v3, %v813_v3 }
 0x80c   : > { %1960 = vmatmul.mubr.msk.bf16.vlgmr.msra.gmra.mxu0 %vm2428_vm9, %v1719_v4 }
 0x80d   : > { %1987 = vmatprep.mubr.msk.bf16.mxu0 %vm2272_vm0, %v2271_v1  ;;  %1984 = vmatpush3.bf16.msra.mxu0 %v2550_v57 }
 0x80e   : > { %1985 = vmatprep.subr.bf16.mxu0 %v2271_v1 }
 0x811   : > { %1986 = vmatpush3.bf16.msra.mxu0 %v2553_v59 }
 0x812   : > { %2011 = vmatprep.subr.bf16.mxu0 %v2271_v1 }
 0x8cc   : > { %v858_v10 = vpop.f32.mrf.mxu0 }
 0x8cd   : > { %v868_v11 = vadd.f32 %v1721_v9, %v858_v10  ;;  %v1120_v9 = vld [vmem:[#allocation2 + $0x420] sm:$0xff]  ;;  %v1117_v10 = vld [vmem:[#allocation2 + $0x408] sm:$0xff] }
 0x8ce   : > { %v1961_v12 = vpop.f32.mrf.mxu0 }
 0x8cf   : > { %v1722_v13 = vmul.f32 -1.442695, %v868_v11  ;;  %v1118_v12 = vld [vmem:[#allocation2 + $0x410] sm:$0xff] }
 0x8d0   : > { %v861_v7 = vpop.f32.mrf.mxu0 }
 0x8d1   : > { %2129 = vpow2.f32 %v1722_v13  ;;  %v1149_v13 = vpack.c.bf16 %v1118_v12, %v1117_v10  ;;  %v1116_v7 = vld [vmem:[#allocation2 + $0x400] sm:$0xff] }
 0x8d2   : > { %v1962_v33 = vpop.f32.mrf.mxu0 }
 0x8de   : > { %v2130_v14 = vpop.eup %2129 }
 0x8df   : > { %v872_v15 = vadd.f32 1.0, %v2130_v14  ;;  %v1113_v14 = vld [vmem:[#allocation2 + $0x3e8] sm:$0xff] }
 0x8e1   : > { %2131 = vrcp.f32 %v872_v15  ;;  %v1114_v15 = vld [vmem:[#allocation2 + $0x3f0] sm:$0xff] }
 0x8e2   : > { %v1147_v17 = vpack.c.bf16 %v1114_v15, %v1113_v14 }
 0x8ee   : > { %v2132_v20 = vpop.eup %2131 }
 0x8ef   : > { %876 = vrot.lane.b32.xlu0 %v2132_v20, %s2276_s22 }
 0x961   : > { %v877_v23 = vpop.permute.xlu0 %876 }
 0x962   : > { %v2524_v26 = vmul.f32 %v877_v23, %v868_v11  ;;  %v1150_v11 = vpack.c.bf16 %v1120_v9, %v1119_v6  ;;  %v1145_v23 = vpack.c.bf16 %v1110_v22, %v1109_v21 }
 0x964   : > { %v884_v27 = vpack.c.bf16 %v2524_v26, %v2524_v26 }
 0x966   : > { %1968 = vmatmul.mubr.msk.bf16.vlgmr.msra.gmra.mxu1 %vm320_vm3, %v884_v27  ;;  %v1108_v27 = vld [vmem:[#allocation2 + $0x3c0] sm:$0xff] }
 0x967   : > { %1972 = vmatpush3.bf16.xpose.msra.mxu1 %v2530_v28  ;;  %1973 = vmatprep.mubr.msk.bf16.mxu1 %vm2272_vm0, %v2271_v1  ;;  %v1144_v31 = vpack.c.bf16 %v1108_v27, %v1107_v25 }
 0x968   : > { %1977 = vmatprep.subr.bf16.mxu1 %v2271_v1 }
 0xa26   : > { %v924_v30 = vpop.f32.mrf.mxu1 }
 0xa27   : > { %v935_v34 = vadd.f32 %v2537_v29, %v924_v30  ;;  %v2575_v30 = vld [vmem:[#allocation2 + $0x318] ss:$0 sm:$0xff] }
 0xa28   : > { %v1969_v35 = vpop.f32.mrf.mxu1 }
 0xa29   : > { %v936_v36 = vadd.f32 %v935_v34, %v2485_v16 }
 0xa2a   : > { %v927_v37 = vpop.f32.mrf.mxu1 }
 0xa2b   : > { %v937_v40 = vmul.f32 0.70710677, %v936_v36  ;;  %v1105_v37 = vld [vmem:[#allocation2 + $0x3a8] sm:$0xff] }
 0xa2c   : > { %v1970_v41 = vpop.f32.mrf.mxu1 }
 0xa2d   : > { %v938_v42 = vpack.c.bf16 %v937_v40, %v937_v40  ;;  %v1143_v41 = vpack.c.bf16 %v1106_v38, %v1105_v37 }
 0xa2f   : > { %1974 = vmatmul.mubr.msk.bf16.vlgmr.msra.gmra.mxu1 %vm320_vm3, %v938_v42 }
 0xa30   : > { %1978 = vmatpush3.bf16.msra.mxu1 %v2542_v43  ;;  %1979 = vmatprep.mubr.msk.bf16.mxu1 %vm2272_vm0, %v2271_v1 }
 0xa31   : > { %1991 = vmatprep.subr.bf16.mxu1 %v2271_v1 }
 0xaef   : > { %v979_v39 = vpop.f32.mrf.mxu1 }
 0xaf0   : > { %v986_v44 = vsel %vm985_vm14, %v979_v39, -inf }
 0xaf1   : > { %987 = vmax.xlane.f32.xlu1 %v986_v44  ;;  %v1975_v45 = vpop.f32.mrf.mxu1 }
 0xaf3   : > { %v982_v46 = vpop.f32.mrf.mxu1 }
 0xaf5   : > { %v1976_v47 = vpop.f32.mrf.mxu1 }
 0xb7a   : > { %v988_v48 = vpop.xlane.xlu1 %987 }
 0xb7b   : > { %v989_v49 = vsub.f32 %v979_v39, %v988_v48 }
 0xb7d   : > { %v990_v50 = vmul.f32 1.442695, %v989_v49 }
 0xb7f   : > { %2133 = vpow2.f32 %v990_v50 }
 0xb8c   : > { %v2134_v52 = vpop.eup %2133 }
 0xb8d   : > { %v992_v53 = vsel %vm985_vm14, %v2134_v52, 0.0 }
 0xb8e   : > { %993 = vadd.xlane.f32.xlu0 %v992_v53 }
 0xc17   : > { %v994_v60 = vpop.xlane.xlu0 %993 }
 0xc18   : > { %2135 = vrcp.f32 %v994_v60  ;;  %v1732_v60 = vld [vmem:[#allocation2 + $0x428] ss:$0 sm:$0xff] }
 0xc25   : > { %v2136_v61 = vpop.eup %2135 }
 0xc26   : > { %v996_v62 = vmul.f32 %v2136_v61, %v2134_v52 }
 0xc28   : > { %v997_v63 = vpack.c.bf16 %v996_v62, %v996_v62 }
 0xc2a   : > { %1980 = vmatmul.mubr.msk.bf16.vlgmr.msra.gmra.mxu1 %vm985_vm14, %v997_v63 }
 0xc2b   : > { %2007 = vmatprep.mubr.msk.bf16.mxu1 %vm2272_vm0, %v2271_v1  ;;  %1992 = vmatpush3.bf16.msra.mxu1 %v1150_v11 }
 0xc2c   : > { %1993 = vmatprep.subr.bf16.mxu1 %v2271_v1 }
 0xc2f   : > { %1994 = vmatpush3.bf16.msra.mxu1 %v1149_v13 }
 0xc30   : > { %1995 = vmatprep.subr.bf16.mxu1 %v2271_v1 }
 0xcea   : > { %v1039_v0 = vpop.f32.mrf.mxu1 }
 0xceb   : > { %v1049_v2 = vpack.c.bf16 %v1039_v0, %v1039_v0 }
 0xcec   : > { %v1981_v3 = vpop.f32.mrf.mxu1 }
 0xced   : > { %1988 = vmatmul.mubr.msk.bf16.vlgmr.msra.gmra.mxu0 %vm320_vm3, %v1049_v2 }
 0xcee   : > { %v1042_v4 = vpop.f32.mrf.mxu1  ;;  %2012 = vmatpush3.bf16.msra.mxu0 %v2514_v8  ;;  %2015 = vmatprep.mubr.msk.bf16.mxu0 %vm2272_vm0, %v2271_v1  ;;  %v1115_v8 = vld [vmem:[#allocation2 + $0x3f8] sm:$0xff] }
 0xcef   : > { %2013 = vmatprep.subr.bf16.mxu0 %v2271_v1  ;;  %v1148_v33 = vpack.c.bf16 %v1116_v7, %v1115_v8 }
 0xcf0   : > { %v1982_v5 = vpop.f32.mrf.mxu1 }
 0xcf1   : > { %1996 = vmatpush3.bf16.msra.mxu1 %v1148_v33 }
 0xcf2   : > { %2014 = vmatpush3.bf16.msra.mxu0 %v2518_v19  ;;  %1997 = vmatprep.subr.bf16.mxu1 %v2271_v1  ;;  %v1112_v19 = vld [vmem:[#allocation2 + $0x3e0] sm:$0xff] }
 0xcf3   : > { %2019 = vmatprep.subr.bf16.mxu0 %v2271_v1  ;;  %v1146_v20 = vpack.c.bf16 %v1112_v19, %v1111_v18 }
 0xcf5   : > { %1998 = vmatpush3.bf16.msra.mxu1 %v1147_v17 }
 0xcf6   : > { %1999 = vmatprep.subr.bf16.mxu1 %v2271_v1 }
 0xcf9   : > { %2000 = vmatpush3.bf16.msra.mxu1 %v1146_v20 }
 0xcfa   : > { %2001 = vmatprep.subr.bf16.mxu1 %v2271_v1 }
 0xcfd   : > { %2002 = vmatpush3.bf16.msra.mxu1 %v1145_v23 }
 0xcfe   : > { %2003 = vmatprep.subr.bf16.mxu1 %v2271_v1 }
 0xd01   : > { %2004 = vmatpush3.bf16.msra.mxu1 %v1144_v31 }
 0xd02   : > { %2005 = vmatprep.subr.bf16.mxu1 %v2271_v1 }
 0xd05   : > { %2006 = vmatpush3.bf16.msra.mxu1 %v1143_v41 }
 0xd06   : > { %2039 = vmatprep.subr.bf16.mxu1 %v2271_v1 }
 0xdad   : > { %v1089_v32 = vpop.f32.mrf.mxu0 }
 0xdae   : > { %v1100_v34 = vadd.f32 %v2575_v30, %v1089_v32 }
 0xdaf   : > { %v1989_v35 = vpop.f32.mrf.mxu0 }
 0xdb0   : > { %v1101_v36 = vadd.f32 %v1100_v34, %v2524_v26 }
 0xdb1   : > { %v1092_v40 = vpop.f32.mrf.mxu0 }
 0xdb2   : > { %v1102_v42 = vmul.f32 0.70710677, %v1101_v36  ;;  %v1427_v40 = vld [vmem:[#allocation2 + $0x2c0] sm:$0xff] }
 0xdb3   : > { %v1990_v39 = vpop.f32.mrf.mxu0 }
 0xdb4   : > { %v1103_v44 = vadd.f32 %v1102_v42, %v2500_v51  ;;  %v1424_v42 = vld [vmem:[#allocation2 + $0x2a8] sm:$0xff] }
 0xdb6   : > { %v2581_v45 = vmul.f32 0.70710677, %v1103_v44  ;;  %v1482_v44 = vld [vmem:[#allocation2 + $0x440] sm:$0xff] }
 0xdb8   : > { %v1123_v46 = vrot.slane %v2581_v45, 6 }
 0xdba   : > { %v1125_v47 = vsel %vm797_vm12, 1.0, %v1123_v46  ;;  %v1134_v48 = vrot.slane %v1123_v46, 2  ;;  %v1128_v49 = vrot.slane %v1123_v46, 1  ;;  %v1483_v46 = vld [vmem:[#allocation2 + $0x448] sm:$0xff] }
 0xdbb   : > { %v1133_v26 = vrot.slane %v1125_v47, 2  ;;  %v1127_v50 = vrot.slane %v1125_v47, 1 }
 0xdbd   : > { %v1135_v52 = vsel %vm402_vm5, %v1133_v26, %v1134_v48  ;;  %v1129_v53 = vsel %vm395_vm6, %v1127_v50, %v1128_v49 }
 0xdbe   : > { %1136 = vrot.lane.b32.xlu1 %v1135_v52, %s2274_s14  ;;  %1130 = vrot.lane.b32.xlu0 %v1129_v53, %s2275_s20  ;;  %s2175_s14 = sshll.u32 %s2277_s13, 4  ;;  %s2176_s14 = int_to_ptr.vmem [resolvable:$false] %s2175_s14 }
 0xdbf   : > { %s2177_s20 = scalar_lea.vmem %s2176_s14, 256  ;;  %p2178_p11 = scmp.lt.s32.totalorder %s1572_s10, %s2176_s14 }
 0xdc0   : > { %p2179_p12 = scmp.lt.s32.totalorder %s2177_s20, %s2171_s12 }
 0xdc2   : > { %p2180_p13 = por %p2179_p12, %p2178_p11 }
 0xdc4   : > { %p2181_p0 = pnand %p2180_p13, %p2174_p10 }
 0xe30   : > { %v1137_v51 = vpop.permute.xlu1 %1136  ;;  %v1131_v54 = vpop.permute.xlu0 %1130 }
 0xe31   : > { %v1139_v55 = vsel %vm320_vm3, %v1125_v47, %v1131_v54  ;;  %v1486_v47 = vpack.c.bf16 %v1483_v46, %v1482_v44 }
 0xe32   : > { %v1140_v56 = vsel %vm410_vm7, %v1139_v55, %v1137_v51 }
 0xe33   : > { %v1730_v58 = vpack.c.bf16 %v1140_v56, %v1140_v56 }
 0xe35   : > { %2008 = vmatmul.mubr.msk.bf16.vlgmr.msra.gmra.mxu1 %vm2428_vm9, %v1730_v58  ;;  %v1480_v58 = vld [vmem:[#allocation2 + $0x430] sm:$0xff] }
 0xe36   : > { %2043 = vmatprep.mubr.msk.bf16.mxu1 %vm2272_vm0, %v2271_v1 }
 0xef5   : > { %v1185_v61 = vpop.f32.mrf.mxu1 }
 0xef6   : > { %v1195_v62 = vadd.f32 %v1732_v60, %v1185_v61 }
 0xef7   : > { %v2009_v63 = vpop.f32.mrf.mxu1 }
 0xef8   : > { %v1733_v0 = vmul.f32 -1.442695, %v1195_v62 }
 0xef9   : > { %v1188_v2 = vpop.f32.mrf.mxu1 }
 0xefa   : > { %2137 = vpow2.f32 %v1733_v0 }
 0xefb   : > { %v2010_v3 = vpop.f32.mrf.mxu1 }
 0xf07   : > { %v2138_v4 = vpop.eup %2137 }
 0xf08   : > { %v1199_v5 = vadd.f32 1.0, %v2138_v4 }
 0xf0a   : > { %2139 = vrcp.f32 %v1199_v5 }
 0xf17   : > { %v2140_v6 = vpop.eup %2139 }
 0xf18   : > { %1203 = vrot.lane.b32.xlu1 %v2140_v6, %s2276_s22 }
 0xf8a   : > { %v1204_v9 = vpop.permute.xlu1 %1203 }
 0xf8b   : > { %v2596_v24 = vmul.f32 %v1204_v9, %v1195_v62 }
 0xf8d   : > { %v1211_v10 = vpack.c.bf16 %v2596_v24, %v2596_v24 }
 0xf8f   : > { %2016 = vmatmul.mubr.msk.bf16.vlgmr.msra.gmra.mxu0 %vm320_vm3, %v1211_v10 }
 0xf90   : > { %2020 = vmatpush3.bf16.xpose.msra.mxu0 %v2530_v28  ;;  %2021 = vmatprep.mubr.msk.bf16.mxu0 %vm2272_vm0, %v2271_v1 }
 0xf91   : > { %2025 = vmatprep.subr.bf16.mxu0 %v2271_v1 }
0x104f   : > { %v1251_v11 = vpop.f32.mrf.mxu0 }
0x1050   : > { %v1262_v12 = vadd.f32 %v2537_v29, %v1251_v11 }
0x1051   : > { %v2017_v13 = vpop.f32.mrf.mxu0 }
0x1052   : > { %v1263_v8 = vadd.f32 %v1262_v12, %v2485_v16 }
0x1053   : > { %v1254_v7 = vpop.f32.mrf.mxu0 }
0x1054   : > { %v1264_v33 = vmul.f32 0.70710677, %v1263_v8 }
0x1055   : > { %v2018_v14 = vpop.f32.mrf.mxu0 }
0x1056   : > { %v1265_v15 = vpack.c.bf16 %v1264_v33, %v1264_v33 }
0x1058   : > { %2022 = vmatmul.mubr.msk.bf16.vlgmr.msra.gmra.mxu0 %vm320_vm3, %v1265_v15 }
0x1059   : > { %2026 = vmatpush3.bf16.msra.mxu0 %v2542_v43  ;;  %2027 = vmatprep.mubr.msk.bf16.mxu0 %vm2272_vm0, %v2271_v1 }
0x105a   : > { %2031 = vmatprep.subr.bf16.mxu0 %v2271_v1 }
0x1118   : > { %v1303_v28 = vpop.f32.mrf.mxu0 }
0x1119   : > { %v1309_v29 = vsel %vm985_vm14, %v1303_v28, -inf }
0x111a   : > { %1310 = vmax.xlane.f32.xlu0 %v1309_v29  ;;  %v2023_v17 = vpop.f32.mrf.mxu0 }
0x111c   : > { %v1306_v16 = vpop.f32.mrf.mxu0 }
0x111e   : > { %v2024_v18 = vpop.f32.mrf.mxu0 }
0x11a3   : > { %v1311_v19 = vpop.xlane.xlu0 %1310 }
0x11a4   : > { %v1312_v20 = vsub.f32 %v1303_v28, %v1311_v19 }
0x11a6   : > { %v1313_v21 = vmul.f32 1.442695, %v1312_v20 }
0x11a8   : > { %2141 = vpow2.f32 %v1313_v21 }
0x11b5   : > { %v2142_v22 = vpop.eup %2141 }
0x11b6   : > { %v1315_v43 = vsel %vm985_vm14, %v2142_v22, 0.0 }
0x11b7   : > { %1316 = vadd.xlane.f32.xlu1 %v1315_v43 }
0x1240   : > { %v1317_v23 = vpop.xlane.xlu1 %1316 }
0x1241   : > { %2143 = vrcp.f32 %v1317_v23 }
0x124e   : > { %v2144_v25 = vpop.eup %2143 }
0x124f   : > { %v1319_v27 = vmul.f32 %v2144_v25, %v2142_v22 }
0x1251   : > { %v1320_v31 = vpack.c.bf16 %v1319_v27, %v1319_v27  ;;  %v1537_v32 = vsel %vm985_vm14, %v1319_v27, 0.0 }
0x1252   : > { %1538 = vst [vmem:[%s2621_s5] sm:$0xff] %v1537_v32 }
0x1253   : > { %2028 = vmatmul.mubr.msk.bf16.vlgmr.msra.gmra.mxu0 %vm985_vm14, %v1320_v31 }
0x1254   : > { %2032 = vmatpush3.bf16.msra.mxu0 %v2550_v57  ;;  %2035 = vmatprep.mubr.msk.bf16.mxu0 %vm2272_vm0, %v2271_v1  ;;  %v1426_v57 = vld [vmem:[#allocation2 + $0x2b8] sm:$0xff] }
0x1255   : > { %2033 = vmatprep.subr.bf16.mxu0 %v2271_v1  ;;  %v1430_v41 = vpack.c.bf16 %v1427_v40, %v1426_v57 }
0x1257   : > { %2040 = vmatpush3.bf16.msra.mxu1 %v1430_v41 }
0x1258   : > { %2034 = vmatpush3.bf16.msra.mxu0 %v2553_v59  ;;  %2041 = vmatprep.subr.bf16.mxu1 %v2271_v1  ;;  %v1425_v59 = vld [vmem:[#allocation2 + $0x2b0] sm:$0xff] }
0x1259   : > { %2047 = vmatprep.subr.bf16.mxu0 %v2271_v1  ;;  %v1429_v39 = vpack.c.bf16 %v1425_v59, %v1424_v42 }
0x125b   : > { %2042 = vmatpush3.bf16.msra.mxu1 %v1429_v39 }
0x1313   : > { %v1358_v34 = vpop.f32.mrf.mxu0 }
0x1314   : > { %v1368_v35 = vpack.c.bf16 %v1358_v34, %v1358_v34 }
0x1315   : > { %v2029_v36 = vpop.f32.mrf.mxu0 }
0x1316   : > { %2036 = vmatmul.mubr.msk.bf16.vlgmr.msra.gmra.mxu0 %vm320_vm3, %v1368_v35 }
0x1317   : > { %v1361_v37 = vpop.f32.mrf.mxu0  ;;  %2051 = vmatprep.mubr.msk.bf16.mxu0 %vm2272_vm0, %v2271_v1  ;;  %2048 = vmatpush3.bf16.msra.mxu0 %v1486_v47 }
0x1318   : > { %2049 = vmatprep.subr.bf16.mxu0 %v2271_v1  ;;  %v1481_v1 = vld [vmem:[#allocation2 + $0x438] sm:$0xff] }
0x1319   : > { %v2030_v38 = vpop.f32.mrf.mxu0  ;;  %v1485_v60 = vpack.c.bf16 %v1481_v1, %v1480_v58 }
0x131b   : > { %2050 = vmatpush3.bf16.msra.mxu0 %v1485_v60 }
0x13d6   : > { %v1408_v48 = vpop.f32.mrf.mxu0 }
0x13d7   : > { %v1419_v49 = vadd.f32 %v2575_v30, %v1408_v48  ;;  %v1741_v30 = vld [vmem:[#allocation2 + $0x2c8] ss:$0 sm:$0xff] }
0x13d8   : > { %v2037_v26 = vpop.f32.mrf.mxu0 }
0x13d9   : > { %v1420_v50 = vadd.f32 %v1419_v49, %v2596_v24 }
0x13da   : > { %v1411_v52 = vpop.f32.mrf.mxu0 }
0x13db   : > { %v1421_v53 = vmul.f32 0.70710677, %v1420_v50 }
0x13dc   : > { %v2038_v51 = vpop.f32.mrf.mxu0 }
0x13dd   : > { %v1422_v54 = vadd.f32 %v1421_v53, %v2581_v45 }
0x13df   : > { %v1423_v55 = vmul.f32 0.70710677, %v1422_v54 }
0x13e1   : > { %v1428_v56 = vpack.c.bf16 %v1423_v55, %v1423_v55 }
0x13e3   : > { %2044 = vmatmul.mubr.msk.bf16.vlgmr.msra.gmra.mxu1 %vm320_vm3, %v1428_v56 }
0x14a3   : > { %v1468_v61 = vpop.f32.mrf.mxu1 }
0x14a4   : > { %v1479_v62 = vadd.f32 %v1741_v30, %v1468_v61 }
0x14a5   : > { %v2045_v63 = vpop.f32.mrf.mxu1 }
0x14a6   : > { %v1484_v0 = vpack.c.bf16 %v1479_v62, %v1479_v62 }
0x14a7   : > { %v1471_v2 = vpop.f32.mrf.mxu1 }
0x14a8   : > { %2052 = vmatmul.mubr.msk.bf16.vlgmr.msra.gmra.mxu0 %vm320_vm3, %v1484_v0 }
0x14a9   : > { %v2046_v45 = vpop.f32.mrf.mxu1 }
0x14aa   : > { %2184 = shalt.err (!%p2181_p0)
}
0x14ab   : > { %s2185_s22 = scalar_lea.hbm %s1569_s9, 128  ;;  %s2189_s28 = scalar_lea.hbm %s2714_s4, 256 }
0x14ac   : > { %p2186_p1 = scmp.ne.s32.totalorder %s1569_s9, %s2185_s22  ;;  %p2190_p4 = scmp.lt.s32.totalorder %s1569_s9, %s2714_s4 }
0x14ad   : > { %p2191_p7 = scmp.lt.s32.totalorder %s2189_s28, %s2185_s22 }
0x14ae   : > { %p2187_p2 = pnand %p2186_p1, %p2342_p5 }
0x14af   : > { %p2192_p8 = por %p2191_p7, %p2190_p4 }
0x14b0   : > { %p2188_p3 = pneg %p2187_p2 }
0x14b2   : > { %p2193_p6 = pnand %p2192_p8, %p2188_p3 }
0x14b4   : > { %2196 = shalt.err (!%p2193_p6)
}
0x14b5   : > { %2060 = dma.vmem_to_hbm [thread:$0]  (%p2342_p5), %s1572_s10, 128, %s1569_s9, %s1545_s11   ;;  %v1743_v3 = vld [vmem:[#allocation2 + $0x450] ss:$0 sm:$0xff] }
0x14b6   : > { %s220_s8 = scalar_lea.vmem [#allocation5], %s1692_s30  ;;  %s2668_s20 = scalar_lea.hbm %s2713_s3, %s1746_s6 }
0x14b7   : > { %s1558_s12 = sshll.u32 %s220_s8, 4  ;;  %s1540_s9 = scalar_lea.sflag [#allocation4], %s2615_s29  ;;  %s2670_s12 = int_to_ptr.vmem [resolvable:$true] %s1558_s12 }
0x14b8   : > { %s2197_s10 = scalar_lea.vmem %s2670_s12, 128  ;;  %s2278_s19 = smov [#allocation5]  }
0x14b9   : > { %p2198_p9 = scmp.ne.s32.totalorder %s2670_s12, %s2197_s10  ;;  %s2201_s30 = sshll.u32 %s2278_s19, 4  ;;  %s2202_s30 = int_to_ptr.vmem [resolvable:$false] %s2201_s30 }
0x14ba   : > { %s2203_s11 = scalar_lea.vmem %s2202_s30, 256  ;;  %p2204_p12 = scmp.lt.s32.totalorder %s2670_s12, %s2202_s30 }
0x14bb   : > { %p2199_p10 = pnand %p2198_p9, %p2342_p5  ;;  %p2205_p13 = scmp.lt.s32.totalorder %s2203_s11, %s2197_s10 }
0x14bd   : > { %p2200_p11 = pneg %p2199_p10  ;;  %p2206_p0 = por %p2205_p13, %p2204_p12 }
0x14bf   : > { %p2207_p1 = pnand %p2206_p0, %p2200_p11 }
0x1568   : > { %v1524_v4 = vpop.f32.mrf.mxu0 }
0x1569   : > { %v1535_v5 = vadd.f32 %v1743_v3, %v1524_v4 }
0x156a   : > { %v2053_v6 = vpop.f32.mrf.mxu0 }
0x156b   : > { %1536 = vst [vmem:[%s220_s8] sm:$0xff] %v1535_v5 }
0x156c   : > { %v1527_v9 = vpop.f32.mrf.mxu0 }
0x156d   : > { %2210 = shalt.err (!%p2207_p1)
}
0x156e   : > { %s2211_s6 = scalar_lea.hbm %s2668_s20, 128  ;;  %s2215_s23 = scalar_lea.hbm %s2713_s3, 256 }
0x156f   : > { %p2212_p2 = scmp.ne.s32.totalorder %s2668_s20, %s2211_s6  ;;  %p2216_p7 = scmp.lt.s32.totalorder %s2668_s20, %s2713_s3 }
0x1570   : > { %p2217_p8 = scmp.lt.s32.totalorder %s2215_s23, %s2211_s6 }
0x1571   : > { %p2213_p3 = pnand %p2212_p2, %p2342_p5 }
0x1572   : > { %p2218_p6 = por %p2217_p8, %p2216_p7 }
0x1573   : > { %p2214_p4 = pneg %p2213_p3 }
0x1575   : > { %p2219_p9 = pnand %p2218_p6, %p2214_p4 }
0x1577   : > { %2222 = shalt.err (!%p2219_p9)
}
0x1578   : > { %2059 = dma.vmem_to_hbm [thread:$0]  (%p2342_p5), %s2670_s12, 128, %s2668_s20, %s1540_s9   ;;  %v2054_v24 = vpop.f32.mrf.mxu0 }
0x1579 PF: > { %p2076_p10 = scmp.ge.s32.totalorder %s2265_s18, 2  ;;  %s1583_s5 = sand.u32 1, %s2253_s15  }
0x157a   : > { %p2720_p11 = scmp.ne.s32.totalorder %s2716_s26, 0  ;;  %s1584_s7 = scalar_lea.sflag [#allocation4], %s1583_s5 }
0x157c   : > { %p2068_p12 = pnand %p2076_p10, %p2720_p11 }
0x157e   : > { %p2069_p13 = pneg %p2068_p12 }
0x1580   : > { %2244 = dma.done.wait (%p2069_p13), %s1584_s7, 128  }
0x1581   : > { %2246 = vsyncadd (%p2069_p13), %s1584_s7, 4294967168  ;;  %s1593_s8 = scalar_lea.sflag [#allocation7], %s1583_s5 }
0x1582   : > { %2248 = dma.done.wait (%p2069_p13), %s1593_s8, 128  }
0x1583   : > { %2250 = vsyncadd (%p2069_p13), %s1593_s8, 4294967168  ;;  %p19_p5 = scmp.ge.s32.totalorder %s2329_s21, 4   ;;  %s2721_s15 = smov %s2257_s16 }
0x1584   : > { %s2722_s16 = smov %s2261_s17  ;;  %s2723_s17 = smov %s2340_s24 }
0x1585   : > { %s2724_s18 = smov %s2329_s21  ;;  %21 = sbr.rel (!%p19_p5) target bundleno = 6 (0x6), region = 92 }
0x158a   :  { %1598 = vsyncpa [#allocation3], 1 }
0x158b   :  { %1600 = vsyncpa [#allocation3 + $0x1], 1 }
0x158c   :  { %1601 = vsyncpa [#allocation4], 1 }
0x158d   :  { %1603 = vsyncpa [#allocation4 + $0x1], 1 }
0x158e   :  { %1604 = vsyncpa [#allocation7], 1 }
0x158f   :  { %1606 = vsyncpa [#allocation7 + $0x1], 1 }

</bundles_post_ra>
